<compile_context>
chip_gen: v5e
topology: v5e:2x2
jax: 0.10.0
libtpu: 0.0.40
codegen_flags: <defaults>
</compile_context>

<pallas_src>
import jax
import jax.numpy as jnp
from jax import lax
from jax.experimental import pallas as pl
from jax.experimental.pallas import tpu as pltpu

# DEFAULT: the MXU rounds f32 operands to bf16 (single pass) -- the deliberate,
# documented choice here.  Use lax.Precision.HIGHEST for fp32-level parity with
# the PyTorch reference at ~3-6x MXU passes on the serial chain.
MXU_PRECISION = lax.Precision.DEFAULT


def _dot(a, b):
    return jnp.dot(a, b, preferred_element_type=jnp.float32,
                   precision=MXU_PRECISION)


def _stock_lstm_kernel(x_ref, wih0_ref, whh0_ref, b0_ref,
                       wih1_ref, whh1_ref, b1_ref,
                       wfc1_ref, bfc1_ref, wout_ref, bout_ref,
                       out_ref):
    B, T, I = x_ref.shape
    H = whh0_ref.shape[0]

    # ---- Hoisted layer-0 input projection: one MXU call for all timesteps,
    #      bias folded in.  Kept as a value and sliced with static offsets
    #      under the full unroll (no VMEM scratch round-trip).
    x2 = x_ref[...].reshape(B * T, I)                       # layout-preserving
    gin0 = (_dot(x2, wih0_ref[...]) + b0_ref[...]).reshape(B, T, 4 * H)
    gin0_t = [gin0[:, t, :] for t in range(T)]              # static (B,4H) slices

    # ---- Hoist weight loads / bias broadcast out of the recurrence.
    whh0 = whh0_ref[...]                                    # (H, 4H)
    wih1 = wih1_ref[...]                                    # (H, 4H)
    whh1 = whh1_ref[...]                                    # (H, 4H)
    b1 = jnp.broadcast_to(b1_ref[...], (B, 4 * H))          # hoisted broadcast

    def cell(gates, c_prev):
        # PyTorch gate order: i, f, g, o.  Sigmoid on the full lane-dense
        # (B, 4H) tile (one EUP push), then slice per gate.
        # TODO(synk): audit bundle dump for vrot on the 32-lane gate slices;
        # if hot, reorder gate columns / co-locate c with the f-gate lanes.
        sig = jax.nn.sigmoid(gates)
        i_g = sig[:, 0 * H:1 * H]
        f_g = sig[:, 1 * H:2 * H]
        o_g = sig[:, 3 * H:4 * H]
        g_g = jnp.tanh(gates[:, 2 * H:3 * H])
        c_new = f_g * c_prev + i_g * g_g
        h_new = o_g * jnp.tanh(c_new)
        return h_new, c_new

    def cell0(gates):
        # First step of a layer: h_prev = c_prev = 0, so the f*c term (and the
        # h_prev matmul feeding `gates`) vanishes.
        sig = jax.nn.sigmoid(gates)
        i_g = sig[:, 0 * H:1 * H]
        o_g = sig[:, 3 * H:4 * H]
        g_g = jnp.tanh(gates[:, 2 * H:3 * H])
        c_new = i_g * g_g
        h_new = o_g * jnp.tanh(c_new)
        return h_new, c_new

    # ---- Wavefront-skewed recurrence, fully unrolled (T small).
    #      Iteration t computes layer-0 step t and layer-1 step t-1; both read
    #      only h0(t-1) / h1(t-2), so all three per-step dots can issue as
    #      soon as h0(t-1) is ready and the two cell chains overlap.
    #      (Inter-layer LSTM dropout is inactive in eval mode.)
    h0, c0 = cell0(gin0_t[0])                               # layer 0, t = 0
    h1 = c1 = None                                          # layer 1 lags by 1
    for t in range(1, T):
        g0 = gin0_t[t] + _dot(h0, whh0)                     # layer 0 gates, step t
        if h1 is None:                                      # layer 1, step 0
            g1 = _dot(h0, wih1) + b1
            h1_new, c1_new = cell0(g1)
        else:                                               # layer 1, step t-1
            g1 = _dot(h0, wih1) + _dot(h1, whh1) + b1
            h1_new, c1_new = cell(g1, c1)
        h0, c0 = cell(g0, c0)
        h1, c1 = h1_new, c1_new

    # Epilogue: layer 1, step T-1.
    if h1 is None:                                          # only if T == 1
        g1 = _dot(h0, wih1) + b1
        h1, c1 = cell0(g1)
    else:
        g1 = _dot(h0, wih1) + _dot(h1, whh1) + b1
        h1, c1 = cell(g1, c1)

    # ---- Head: x[:, -1, :] -> fc1 -> ReLU -> (dropout == identity) -> out.
    z = jnp.maximum(_dot(h1, wfc1_ref[...]) + bfc1_ref[...], 0.0)
    # Linear(H, 1) as VPU multiply + lane reduction (avoid an N=1 MXU pass).
    out_ref[...] = (jnp.sum(z * wout_ref[...], axis=-1, keepdims=True)
                    + bout_ref[...])


@jax.jit
def stock_lstm_forward(x, params):
    """x: (B, T, I) float32, batch_first like the PyTorch module.

    The wrapper is pure glue-free: no transpose/pad/concat/out-slice -- the
    pallas_call is the only op in the traced forward.
    """
    B = x.shape[0]

    args = (x,
            params["wih0"], params["whh0"], params["b0"],
            params["wih1"], params["whh1"], params["b1"],
            params["wfc1"], params["bfc1"], params["wout"], params["bout"])

    def full(a):
        nd = a.ndim
        return pl.BlockSpec(a.shape, lambda i: (0,) * nd)

    return pl.pallas_call(
        _stock_lstm_kernel,
        out_shape=jax.ShapeDtypeStruct((B, 1), jnp.float32),
        grid_spec=pltpu.PrefetchScalarGridSpec(
            num_scalar_prefetch=0,
            grid=(1,),                      # whole recurrence in one invocation
            in_specs=[full(a) for a in args],
            out_specs=pl.BlockSpec((B, 1), lambda i: (0, 0)),
        ),
        compiler_params=pltpu.CompilerParams(
            dimension_semantics=("arbitrary",)),
    )(*args)


def init_params(key, input_size, hidden_size):
    """Deterministic PyTorch-style uniform(-1/sqrt(H), 1/sqrt(H)) init.

    All weight formatting (transposes, bias folding) is done here, once, so
    the per-call forward path has zero weight-reshaping XLA ops.
    """
    H = hidden_size
    bound = 1.0 / jnp.sqrt(jnp.float32(H))
    keys = jax.random.split(key, 14)

    def u(k, shape):
        return jax.random.uniform(k, shape, jnp.float32, -bound, bound)

    # LSTM layer 0: W_ih (4H, I), W_hh (4H, H)  -> stored pre-transposed.
    wih0 = u(keys[0], (4 * H, input_size)).T          # (I, 4H)
    whh0 = u(keys[1], (4 * H, H)).T                   # (H, 4H)
    b0 = (u(keys[2], (4 * H,)) + u(keys[3], (4 * H,)))[None, :]   # (1, 4H)
    # LSTM layer 1: W_ih (4H, H), W_hh (4H, H)
    wih1 = u(keys[4], (4 * H, H)).T                   # (H, 4H)
    whh1 = u(keys[5], (4 * H, H)).T                   # (H, 4H)
    b1 = (u(keys[6], (4 * H,)) + u(keys[7], (4 * H,)))[None, :]   # (1, 4H)
    # fc1: Linear(H, H); out: Linear(H, 1)
    wfc1 = u(keys[8], (H, H)).T                       # (H, H)
    bfc1 = u(keys[9], (H,))[None, :]                  # (1, H)
    wout = u(keys[10], (1, H))                        # (1, H) row (VPU reduce)
    bout = u(keys[11], (1,))[None, :]                 # (1, 1)

    return dict(wih0=wih0, whh0=whh0, b0=b0,
                wih1=wih1, whh1=whh1, b1=b1,
                wfc1=wfc1, bfc1=bfc1, wout=wout, bout=bout)


if __name__ == "__main__":
    B, T, I, H = 2, 8, 8, 32   # batch, seq len, input features, hidden size

    key = jax.random.PRNGKey(0)
    k_x, k_p = jax.random.split(key)
    x = jax.random.normal(k_x, (B, T, I), dtype=jnp.float32)
    params = init_params(k_p, I, H)

    y = stock_lstm_forward(x, params)
    jax.block_until_ready(y)
    assert y.shape == (B, 1) and y.dtype == jnp.float32
    assert bool(jnp.all(jnp.isfinite(y)))
    print("KERNEL_OK")
</pallas_src>

<mosaic_0001>
module attributes {stable_mosaic.version = 11 : i64} {
  func.func @_stock_lstm_kernel(%arg0: i32, %arg1: memref<2x8x8xf32, #tpu.memory_space<vmem>>, %arg2: memref<8x128xf32, #tpu.memory_space<vmem>>, %arg3: memref<32x128xf32, #tpu.memory_space<vmem>>, %arg4: memref<1x128xf32, #tpu.memory_space<vmem>>, %arg5: memref<32x128xf32, #tpu.memory_space<vmem>>, %arg6: memref<32x128xf32, #tpu.memory_space<vmem>>, %arg7: memref<1x128xf32, #tpu.memory_space<vmem>>, %arg8: memref<32x32xf32, #tpu.memory_space<vmem>>, %arg9: memref<1x32xf32, #tpu.memory_space<vmem>>, %arg10: memref<1x32xf32, #tpu.memory_space<vmem>>, %arg11: memref<1x1xf32, #tpu.memory_space<vmem>>, %arg12: memref<2x1xf32, #tpu.memory_space<vmem>>) attributes {dimension_semantics = [#tpu.dimension_semantics<arbitrary>], iteration_bounds = array<i64: 1>, scalar_prefetch = 0 : i64, scratch_operands = 0 : i64, tpu.core_type = #tpu.core_type<tc>, window_params = [{pipeline_mode = #tpu.pipeline_mode<synchronous>, transform_indices = @transform_0, window_bounds = array<i64: 2, 8, 8>}, {pipeline_mode = #tpu.pipeline_mode<synchronous>, transform_indices = @transform_1, window_bounds = array<i64: 8, 128>}, {pipeline_mode = #tpu.pipeline_mode<synchronous>, transform_indices = @transform_2, window_bounds = array<i64: 32, 128>}, {pipeline_mode = #tpu.pipeline_mode<synchronous>, transform_indices = @transform_3, window_bounds = array<i64: 1, 128>}, {pipeline_mode = #tpu.pipeline_mode<synchronous>, transform_indices = @transform_4, window_bounds = array<i64: 32, 128>}, {pipeline_mode = #tpu.pipeline_mode<synchronous>, transform_indices = @transform_5, window_bounds = array<i64: 32, 128>}, {pipeline_mode = #tpu.pipeline_mode<synchronous>, transform_indices = @transform_6, window_bounds = array<i64: 1, 128>}, {pipeline_mode = #tpu.pipeline_mode<synchronous>, transform_indices = @transform_7, window_bounds = array<i64: 32, 32>}, {pipeline_mode = #tpu.pipeline_mode<synchronous>, transform_indices = @transform_8, window_bounds = array<i64: 1, 32>}, {pipeline_mode = #tpu.pipeline_mode<synchronous>, transform_indices = @transform_9, window_bounds = array<i64: 1, 32>}, {pipeline_mode = #tpu.pipeline_mode<synchronous>, transform_indices = @transform_10, window_bounds = array<i64: 1, 1>}, {pipeline_mode = #tpu.pipeline_mode<synchronous>, transform_indices = @transform_11, window_bounds = array<i64: 2, 1>}]} {
    %c0 = arith.constant 0 : index
    %c0_0 = arith.constant 0 : index
    %c0_1 = arith.constant 0 : index
    %0 = vector.load %arg1[%c0, %c0_0, %c0_1] : memref<2x8x8xf32, #tpu.memory_space<vmem>>, vector<2x8x8xf32>
    %1 = vector.shape_cast %0 : vector<2x8x8xf32> to vector<16x8xf32>
    %c0_2 = arith.constant 0 : index
    %c0_3 = arith.constant 0 : index
    %2 = vector.load %arg2[%c0_2, %c0_3] : memref<8x128xf32, #tpu.memory_space<vmem>>, vector<8x128xf32>
    %cst = arith.constant dense<0.000000e+00> : vector<16x128xf32>
    %3 = tpu.matmul %1, %2, %cst {dimension_numbers = #tpu.dot_dimension_numbers<[1], [0], [0], [1], [0, 0, 1, 1], [], []>} : vector<16x8xf32>, vector<8x128xf32>, vector<16x128xf32> -> vector<16x128xf32>
    %c0_4 = arith.constant 0 : index
    %c0_5 = arith.constant 0 : index
    %4 = vector.load %arg4[%c0_4, %c0_5] : memref<1x128xf32, #tpu.memory_space<vmem>>, vector<1x128xf32>
    %5 = vector.broadcast %4 : vector<1x128xf32> to vector<16x128xf32>
    %6 = arith.addf %3, %5 : vector<16x128xf32>
    %7 = vector.shape_cast %6 : vector<16x128xf32> to vector<2x8x128xf32>
    %8 = vector.extract_strided_slice %7 {offsets = [0, 0, 0], sizes = [2, 1, 128], strides = [1, 1, 1]} : vector<2x8x128xf32> to vector<2x1x128xf32>
    %9 = vector.shape_cast %8 : vector<2x1x128xf32> to vector<2x128xf32>
    %10 = vector.extract_strided_slice %7 {offsets = [0, 1, 0], sizes = [2, 1, 128], strides = [1, 1, 1]} : vector<2x8x128xf32> to vector<2x1x128xf32>
    %11 = vector.shape_cast %10 : vector<2x1x128xf32> to vector<2x128xf32>
    %12 = vector.extract_strided_slice %7 {offsets = [0, 2, 0], sizes = [2, 1, 128], strides = [1, 1, 1]} : vector<2x8x128xf32> to vector<2x1x128xf32>
    %13 = vector.shape_cast %12 : vector<2x1x128xf32> to vector<2x128xf32>
    %14 = vector.extract_strided_slice %7 {offsets = [0, 3, 0], sizes = [2, 1, 128], strides = [1, 1, 1]} : vector<2x8x128xf32> to vector<2x1x128xf32>
    %15 = vector.shape_cast %14 : vector<2x1x128xf32> to vector<2x128xf32>
    %16 = vector.extract_strided_slice %7 {offsets = [0, 4, 0], sizes = [2, 1, 128], strides = [1, 1, 1]} : vector<2x8x128xf32> to vector<2x1x128xf32>
    %17 = vector.shape_cast %16 : vector<2x1x128xf32> to vector<2x128xf32>
    %18 = vector.extract_strided_slice %7 {offsets = [0, 5, 0], sizes = [2, 1, 128], strides = [1, 1, 1]} : vector<2x8x128xf32> to vector<2x1x128xf32>
    %19 = vector.shape_cast %18 : vector<2x1x128xf32> to vector<2x128xf32>
    %20 = vector.extract_strided_slice %7 {offsets = [0, 6, 0], sizes = [2, 1, 128], strides = [1, 1, 1]} : vector<2x8x128xf32> to vector<2x1x128xf32>
    %21 = vector.shape_cast %20 : vector<2x1x128xf32> to vector<2x128xf32>
    %22 = vector.extract_strided_slice %7 {offsets = [0, 7, 0], sizes = [2, 1, 128], strides = [1, 1, 1]} : vector<2x8x128xf32> to vector<2x1x128xf32>
    %23 = vector.shape_cast %22 : vector<2x1x128xf32> to vector<2x128xf32>
    %c0_6 = arith.constant 0 : index
    %c0_7 = arith.constant 0 : index
    %24 = vector.load %arg3[%c0_6, %c0_7] : memref<32x128xf32, #tpu.memory_space<vmem>>, vector<32x128xf32>
    %c0_8 = arith.constant 0 : index
    %c0_9 = arith.constant 0 : index
    %25 = vector.load %arg5[%c0_8, %c0_9] : memref<32x128xf32, #tpu.memory_space<vmem>>, vector<32x128xf32>
    %c0_10 = arith.constant 0 : index
    %c0_11 = arith.constant 0 : index
    %26 = vector.load %arg6[%c0_10, %c0_11] : memref<32x128xf32, #tpu.memory_space<vmem>>, vector<32x128xf32>
    %c0_12 = arith.constant 0 : index
    %c0_13 = arith.constant 0 : index
    %27 = vector.load %arg7[%c0_12, %c0_13] : memref<1x128xf32, #tpu.memory_space<vmem>>, vector<1x128xf32>
    %28 = vector.shape_cast %27 : vector<1x128xf32> to vector<1x128xf32>
    %29 = vector.broadcast %28 : vector<1x128xf32> to vector<2x128xf32>
    %30 = arith.negf %9 : vector<2x128xf32>
    %31 = math.exp %30 : vector<2x128xf32>
    %cst_14 = arith.constant 1.000000e+00 : f32
    %32 = vector.broadcast %cst_14 : f32 to vector<2x128xf32>
    %33 = arith.addf %32, %31 : vector<2x128xf32>
    %34 = arith.divf %32, %33 : vector<2x128xf32>
    %35 = vector.extract_strided_slice %34 {offsets = [0, 0], sizes = [2, 32], strides = [1, 1]} : vector<2x128xf32> to vector<2x32xf32>
    %36 = vector.extract_strided_slice %34 {offsets = [0, 96], sizes = [2, 32], strides = [1, 1]} : vector<2x128xf32> to vector<2x32xf32>
    %37 = vector.extract_strided_slice %9 {offsets = [0, 64], sizes = [2, 32], strides = [1, 1]} : vector<2x128xf32> to vector<2x32xf32>
    %38 = math.tanh %37 : vector<2x32xf32>
    %39 = arith.mulf %35, %38 : vector<2x32xf32>
    %40 = math.tanh %39 : vector<2x32xf32>
    %41 = arith.mulf %36, %40 : vector<2x32xf32>
    %cst_15 = arith.constant dense<0.000000e+00> : vector<2x128xf32>
    %42 = tpu.matmul %41, %24, %cst_15 {dimension_numbers = #tpu.dot_dimension_numbers<[1], [0], [0], [1], [0, 0, 1, 1], [], []>} : vector<2x32xf32>, vector<32x128xf32>, vector<2x128xf32> -> vector<2x128xf32>
    %43 = arith.addf %11, %42 : vector<2x128xf32>
    %cst_16 = arith.constant dense<0.000000e+00> : vector<2x128xf32>
    %44 = tpu.matmul %41, %25, %cst_16 {dimension_numbers = #tpu.dot_dimension_numbers<[1], [0], [0], [1], [0, 0, 1, 1], [], []>} : vector<2x32xf32>, vector<32x128xf32>, vector<2x128xf32> -> vector<2x128xf32>
    %45 = arith.addf %44, %29 : vector<2x128xf32>
    %46 = arith.negf %45 : vector<2x128xf32>
    %47 = math.exp %46 : vector<2x128xf32>
    %cst_17 = arith.constant 1.000000e+00 : f32
    %48 = vector.broadcast %cst_17 : f32 to vector<2x128xf32>
    %49 = arith.addf %48, %47 : vector<2x128xf32>
    %50 = arith.divf %48, %49 : vector<2x128xf32>
    %51 = vector.extract_strided_slice %50 {offsets = [0, 0], sizes = [2, 32], strides = [1, 1]} : vector<2x128xf32> to vector<2x32xf32>
    %52 = vector.extract_strided_slice %50 {offsets = [0, 96], sizes = [2, 32], strides = [1, 1]} : vector<2x128xf32> to vector<2x32xf32>
    %53 = vector.extract_strided_slice %45 {offsets = [0, 64], sizes = [2, 32], strides = [1, 1]} : vector<2x128xf32> to vector<2x32xf32>
    %54 = math.tanh %53 : vector<2x32xf32>
    %55 = arith.mulf %51, %54 : vector<2x32xf32>
    %56 = math.tanh %55 : vector<2x32xf32>
    %57 = arith.mulf %52, %56 : vector<2x32xf32>
    %58 = arith.negf %43 : vector<2x128xf32>
    %59 = math.exp %58 : vector<2x128xf32>
    %cst_18 = arith.constant 1.000000e+00 : f32
    %60 = vector.broadcast %cst_18 : f32 to vector<2x128xf32>
    %61 = arith.addf %60, %59 : vector<2x128xf32>
    %62 = arith.divf %60, %61 : vector<2x128xf32>
    %63 = vector.extract_strided_slice %62 {offsets = [0, 0], sizes = [2, 32], strides = [1, 1]} : vector<2x128xf32> to vector<2x32xf32>
    %64 = vector.extract_strided_slice %62 {offsets = [0, 32], sizes = [2, 32], strides = [1, 1]} : vector<2x128xf32> to vector<2x32xf32>
    %65 = vector.extract_strided_slice %62 {offsets = [0, 96], sizes = [2, 32], strides = [1, 1]} : vector<2x128xf32> to vector<2x32xf32>
    %66 = vector.extract_strided_slice %43 {offsets = [0, 64], sizes = [2, 32], strides = [1, 1]} : vector<2x128xf32> to vector<2x32xf32>
    %67 = math.tanh %66 : vector<2x32xf32>
    %68 = arith.mulf %64, %39 : vector<2x32xf32>
    %69 = arith.mulf %63, %67 : vector<2x32xf32>
    %70 = arith.addf %68, %69 : vector<2x32xf32>
    %71 = math.tanh %70 : vector<2x32xf32>
    %72 = arith.mulf %65, %71 : vector<2x32xf32>
    %cst_19 = arith.constant dense<0.000000e+00> : vector<2x128xf32>
    %73 = tpu.matmul %72, %24, %cst_19 {dimension_numbers = #tpu.dot_dimension_numbers<[1], [0], [0], [1], [0, 0, 1, 1], [], []>} : vector<2x32xf32>, vector<32x128xf32>, vector<2x128xf32> -> vector<2x128xf32>
    %74 = arith.addf %13, %73 : vector<2x128xf32>
    %cst_20 = arith.constant dense<0.000000e+00> : vector<2x128xf32>
    %75 = tpu.matmul %72, %25, %cst_20 {dimension_numbers = #tpu.dot_dimension_numbers<[1], [0], [0], [1], [0, 0, 1, 1], [], []>} : vector<2x32xf32>, vector<32x128xf32>, vector<2x128xf32> -> vector<2x128xf32>
    %cst_21 = arith.constant dense<0.000000e+00> : vector<2x128xf32>
    %76 = tpu.matmul %57, %26, %cst_21 {dimension_numbers = #tpu.dot_dimension_numbers<[1], [0], [0], [1], [0, 0, 1, 1], [], []>} : vector<2x32xf32>, vector<32x128xf32>, vector<2x128xf32> -> vector<2x128xf32>
    %77 = arith.addf %75, %76 : vector<2x128xf32>
    %78 = arith.addf %77, %29 : vector<2x128xf32>
    %79 = arith.negf %78 : vector<2x128xf32>
    %80 = math.exp %79 : vector<2x128xf32>
    %cst_22 = arith.constant 1.000000e+00 : f32
    %81 = vector.broadcast %cst_22 : f32 to vector<2x128xf32>
    %82 = arith.addf %81, %80 : vector<2x128xf32>
    %83 = arith.divf %81, %82 : vector<2x128xf32>
    %84 = vector.extract_strided_slice %83 {offsets = [0, 0], sizes = [2, 32], strides = [1, 1]} : vector<2x128xf32> to vector<2x32xf32>
    %85 = vector.extract_strided_slice %83 {offsets = [0, 32], sizes = [2, 32], strides = [1, 1]} : vector<2x128xf32> to vector<2x32xf32>
    %86 = vector.extract_strided_slice %83 {offsets = [0, 96], sizes = [2, 32], strides = [1, 1]} : vector<2x128xf32> to vector<2x32xf32>
    %87 = vector.extract_strided_slice %78 {offsets = [0, 64], sizes = [2, 32], strides = [1, 1]} : vector<2x128xf32> to vector<2x32xf32>
    %88 = math.tanh %87 : vector<2x32xf32>
    %89 = arith.mulf %85, %55 : vector<2x32xf32>
    %90 = arith.mulf %84, %88 : vector<2x32xf32>
    %91 = arith.addf %89, %90 : vector<2x32xf32>
    %92 = math.tanh %91 : vector<2x32xf32>
    %93 = arith.mulf %86, %92 : vector<2x32xf32>
    %94 = arith.negf %74 : vector<2x128xf32>
    %95 = math.exp %94 : vector<2x128xf32>
    %cst_23 = arith.constant 1.000000e+00 : f32
    %96 = vector.broadcast %cst_23 : f32 to vector<2x128xf32>
    %97 = arith.addf %96, %95 : vector<2x128xf32>
    %98 = arith.divf %96, %97 : vector<2x128xf32>
    %99 = vector.extract_strided_slice %98 {offsets = [0, 0], sizes = [2, 32], strides = [1, 1]} : vector<2x128xf32> to vector<2x32xf32>
    %100 = vector.extract_strided_slice %98 {offsets = [0, 32], sizes = [2, 32], strides = [1, 1]} : vector<2x128xf32> to vector<2x32xf32>
    %101 = vector.extract_strided_slice %98 {offsets = [0, 96], sizes = [2, 32], strides = [1, 1]} : vector<2x128xf32> to vector<2x32xf32>
    %102 = vector.extract_strided_slice %74 {offsets = [0, 64], sizes = [2, 32], strides = [1, 1]} : vector<2x128xf32> to vector<2x32xf32>
    %103 = math.tanh %102 : vector<2x32xf32>
    %104 = arith.mulf %100, %70 : vector<2x32xf32>
    %105 = arith.mulf %99, %103 : vector<2x32xf32>
    %106 = arith.addf %104, %105 : vector<2x32xf32>
    %107 = math.tanh %106 : vector<2x32xf32>
    %108 = arith.mulf %101, %107 : vector<2x32xf32>
    %cst_24 = arith.constant dense<0.000000e+00> : vector<2x128xf32>
    %109 = tpu.matmul %108, %24, %cst_24 {dimension_numbers = #tpu.dot_dimension_numbers<[1], [0], [0], [1], [0, 0, 1, 1], [], []>} : vector<2x32xf32>, vector<32x128xf32>, vector<2x128xf32> -> vector<2x128xf32>
    %110 = arith.addf %15, %109 : vector<2x128xf32>
    %cst_25 = arith.constant dense<0.000000e+00> : vector<2x128xf32>
    %111 = tpu.matmul %108, %25, %cst_25 {dimension_numbers = #tpu.dot_dimension_numbers<[1], [0], [0], [1], [0, 0, 1, 1], [], []>} : vector<2x32xf32>, vector<32x128xf32>, vector<2x128xf32> -> vector<2x128xf32>
    %cst_26 = arith.constant dense<0.000000e+00> : vector<2x128xf32>
    %112 = tpu.matmul %93, %26, %cst_26 {dimension_numbers = #tpu.dot_dimension_numbers<[1], [0], [0], [1], [0, 0, 1, 1], [], []>} : vector<2x32xf32>, vector<32x128xf32>, vector<2x128xf32> -> vector<2x128xf32>
    %113 = arith.addf %111, %112 : vector<2x128xf32>
    %114 = arith.addf %113, %29 : vector<2x128xf32>
    %115 = arith.negf %114 : vector<2x128xf32>
    %116 = math.exp %115 : vector<2x128xf32>
    %cst_27 = arith.constant 1.000000e+00 : f32
    %117 = vector.broadcast %cst_27 : f32 to vector<2x128xf32>
    %118 = arith.addf %117, %116 : vector<2x128xf32>
    %119 = arith.divf %117, %118 : vector<2x128xf32>
    %120 = vector.extract_strided_slice %119 {offsets = [0, 0], sizes = [2, 32], strides = [1, 1]} : vector<2x128xf32> to vector<2x32xf32>
    %121 = vector.extract_strided_slice %119 {offsets = [0, 32], sizes = [2, 32], strides = [1, 1]} : vector<2x128xf32> to vector<2x32xf32>
    %122 = vector.extract_strided_slice %119 {offsets = [0, 96], sizes = [2, 32], strides = [1, 1]} : vector<2x128xf32> to vector<2x32xf32>
    %123 = vector.extract_strided_slice %114 {offsets = [0, 64], sizes = [2, 32], strides = [1, 1]} : vector<2x128xf32> to vector<2x32xf32>
    %124 = math.tanh %123 : vector<2x32xf32>
    %125 = arith.mulf %121, %91 : vector<2x32xf32>
    %126 = arith.mulf %120, %124 : vector<2x32xf32>
    %127 = arith.addf %125, %126 : vector<2x32xf32>
    %128 = math.tanh %127 : vector<2x32xf32>
    %129 = arith.mulf %122, %128 : vector<2x32xf32>
    %130 = arith.negf %110 : vector<2x128xf32>
    %131 = math.exp %130 : vector<2x128xf32>
    %cst_28 = arith.constant 1.000000e+00 : f32
    %132 = vector.broadcast %cst_28 : f32 to vector<2x128xf32>
    %133 = arith.addf %132, %131 : vector<2x128xf32>
    %134 = arith.divf %132, %133 : vector<2x128xf32>
    %135 = vector.extract_strided_slice %134 {offsets = [0, 0], sizes = [2, 32], strides = [1, 1]} : vector<2x128xf32> to vector<2x32xf32>
    %136 = vector.extract_strided_slice %134 {offsets = [0, 32], sizes = [2, 32], strides = [1, 1]} : vector<2x128xf32> to vector<2x32xf32>
    %137 = vector.extract_strided_slice %134 {offsets = [0, 96], sizes = [2, 32], strides = [1, 1]} : vector<2x128xf32> to vector<2x32xf32>
    %138 = vector.extract_strided_slice %110 {offsets = [0, 64], sizes = [2, 32], strides = [1, 1]} : vector<2x128xf32> to vector<2x32xf32>
    %139 = math.tanh %138 : vector<2x32xf32>
    %140 = arith.mulf %136, %106 : vector<2x32xf32>
    %141 = arith.mulf %135, %139 : vector<2x32xf32>
    %142 = arith.addf %140, %141 : vector<2x32xf32>
    %143 = math.tanh %142 : vector<2x32xf32>
    %144 = arith.mulf %137, %143 : vector<2x32xf32>
    %cst_29 = arith.constant dense<0.000000e+00> : vector<2x128xf32>
    %145 = tpu.matmul %144, %24, %cst_29 {dimension_numbers = #tpu.dot_dimension_numbers<[1], [0], [0], [1], [0, 0, 1, 1], [], []>} : vector<2x32xf32>, vector<32x128xf32>, vector<2x128xf32> -> vector<2x128xf32>
    %146 = arith.addf %17, %145 : vector<2x128xf32>
    %cst_30 = arith.constant dense<0.000000e+00> : vector<2x128xf32>
    %147 = tpu.matmul %144, %25, %cst_30 {dimension_numbers = #tpu.dot_dimension_numbers<[1], [0], [0], [1], [0, 0, 1, 1], [], []>} : vector<2x32xf32>, vector<32x128xf32>, vector<2x128xf32> -> vector<2x128xf32>
    %cst_31 = arith.constant dense<0.000000e+00> : vector<2x128xf32>
    %148 = tpu.matmul %129, %26, %cst_31 {dimension_numbers = #tpu.dot_dimension_numbers<[1], [0], [0], [1], [0, 0, 1, 1], [], []>} : vector<2x32xf32>, vector<32x128xf32>, vector<2x128xf32> -> vector<2x128xf32>
    %149 = arith.addf %147, %148 : vector<2x128xf32>
    %150 = arith.addf %149, %29 : vector<2x128xf32>
    %151 = arith.negf %150 : vector<2x128xf32>
    %152 = math.exp %151 : vector<2x128xf32>
    %cst_32 = arith.constant 1.000000e+00 : f32
    %153 = vector.broadcast %cst_32 : f32 to vector<2x128xf32>
    %154 = arith.addf %153, %152 : vector<2x128xf32>
    %155 = arith.divf %153, %154 : vector<2x128xf32>
    %156 = vector.extract_strided_slice %155 {offsets = [0, 0], sizes = [2, 32], strides = [1, 1]} : vector<2x128xf32> to vector<2x32xf32>
    %157 = vector.extract_strided_slice %155 {offsets = [0, 32], sizes = [2, 32], strides = [1, 1]} : vector<2x128xf32> to vector<2x32xf32>
    %158 = vector.extract_strided_slice %155 {offsets = [0, 96], sizes = [2, 32], strides = [1, 1]} : vector<2x128xf32> to vector<2x32xf32>
    %159 = vector.extract_strided_slice %150 {offsets = [0, 64], sizes = [2, 32], strides = [1, 1]} : vector<2x128xf32> to vector<2x32xf32>
    %160 = math.tanh %159 : vector<2x32xf32>
    %161 = arith.mulf %157, %127 : vector<2x32xf32>
    %162 = arith.mulf %156, %160 : vector<2x32xf32>
    %163 = arith.addf %161, %162 : vector<2x32xf32>
    %164 = math.tanh %163 : vector<2x32xf32>
    %165 = arith.mulf %158, %164 : vector<2x32xf32>
    %166 = arith.negf %146 : vector<2x128xf32>
    %167 = math.exp %166 : vector<2x128xf32>
    %cst_33 = arith.constant 1.000000e+00 : f32
    %168 = vector.broadcast %cst_33 : f32 to vector<2x128xf32>
    %169 = arith.addf %168, %167 : vector<2x128xf32>
    %170 = arith.divf %168, %169 : vector<2x128xf32>
    %171 = vector.extract_strided_slice %170 {offsets = [0, 0], sizes = [2, 32], strides = [1, 1]} : vector<2x128xf32> to vector<2x32xf32>
    %172 = vector.extract_strided_slice %170 {offsets = [0, 32], sizes = [2, 32], strides = [1, 1]} : vector<2x128xf32> to vector<2x32xf32>
    %173 = vector.extract_strided_slice %170 {offsets = [0, 96], sizes = [2, 32], strides = [1, 1]} : vector<2x128xf32> to vector<2x32xf32>
    %174 = vector.extract_strided_slice %146 {offsets = [0, 64], sizes = [2, 32], strides = [1, 1]} : vector<2x128xf32> to vector<2x32xf32>
    %175 = math.tanh %174 : vector<2x32xf32>
    %176 = arith.mulf %172, %142 : vector<2x32xf32>
    %177 = arith.mulf %171, %175 : vector<2x32xf32>
    %178 = arith.addf %176, %177 : vector<2x32xf32>
    %179 = math.tanh %178 : vector<2x32xf32>
    %180 = arith.mulf %173, %179 : vector<2x32xf32>
    %cst_34 = arith.constant dense<0.000000e+00> : vector<2x128xf32>
    %181 = tpu.matmul %180, %24, %cst_34 {dimension_numbers = #tpu.dot_dimension_numbers<[1], [0], [0], [1], [0, 0, 1, 1], [], []>} : vector<2x32xf32>, vector<32x128xf32>, vector<2x128xf32> -> vector<2x128xf32>
    %182 = arith.addf %19, %181 : vector<2x128xf32>
    %cst_35 = arith.constant dense<0.000000e+00> : vector<2x128xf32>
    %183 = tpu.matmul %180, %25, %cst_35 {dimension_numbers = #tpu.dot_dimension_numbers<[1], [0], [0], [1], [0, 0, 1, 1], [], []>} : vector<2x32xf32>, vector<32x128xf32>, vector<2x128xf32> -> vector<2x128xf32>
    %cst_36 = arith.constant dense<0.000000e+00> : vector<2x128xf32>
    %184 = tpu.matmul %165, %26, %cst_36 {dimension_numbers = #tpu.dot_dimension_numbers<[1], [0], [0], [1], [0, 0, 1, 1], [], []>} : vector<2x32xf32>, vector<32x128xf32>, vector<2x128xf32> -> vector<2x128xf32>
    %185 = arith.addf %183, %184 : vector<2x128xf32>
    %186 = arith.addf %185, %29 : vector<2x128xf32>
    %187 = arith.negf %186 : vector<2x128xf32>
    %188 = math.exp %187 : vector<2x128xf32>
    %cst_37 = arith.constant 1.000000e+00 : f32
    %189 = vector.broadcast %cst_37 : f32 to vector<2x128xf32>
    %190 = arith.addf %189, %188 : vector<2x128xf32>
    %191 = arith.divf %189, %190 : vector<2x128xf32>
    %192 = vector.extract_strided_slice %191 {offsets = [0, 0], sizes = [2, 32], strides = [1, 1]} : vector<2x128xf32> to vector<2x32xf32>
    %193 = vector.extract_strided_slice %191 {offsets = [0, 32], sizes = [2, 32], strides = [1, 1]} : vector<2x128xf32> to vector<2x32xf32>
    %194 = vector.extract_strided_slice %191 {offsets = [0, 96], sizes = [2, 32], strides = [1, 1]} : vector<2x128xf32> to vector<2x32xf32>
    %195 = vector.extract_strided_slice %186 {offsets = [0, 64], sizes = [2, 32], strides = [1, 1]} : vector<2x128xf32> to vector<2x32xf32>
    %196 = math.tanh %195 : vector<2x32xf32>
    %197 = arith.mulf %193, %163 : vector<2x32xf32>
    %198 = arith.mulf %192, %196 : vector<2x32xf32>
    %199 = arith.addf %197, %198 : vector<2x32xf32>
    %200 = math.tanh %199 : vector<2x32xf32>
    %201 = arith.mulf %194, %200 : vector<2x32xf32>
    %202 = arith.negf %182 : vector<2x128xf32>
    %203 = math.exp %202 : vector<2x128xf32>
    %cst_38 = arith.constant 1.000000e+00 : f32
    %204 = vector.broadcast %cst_38 : f32 to vector<2x128xf32>
    %205 = arith.addf %204, %203 : vector<2x128xf32>
    %206 = arith.divf %204, %205 : vector<2x128xf32>
    %207 = vector.extract_strided_slice %206 {offsets = [0, 0], sizes = [2, 32], strides = [1, 1]} : vector<2x128xf32> to vector<2x32xf32>
    %208 = vector.extract_strided_slice %206 {offsets = [0, 32], sizes = [2, 32], strides = [1, 1]} : vector<2x128xf32> to vector<2x32xf32>
    %209 = vector.extract_strided_slice %206 {offsets = [0, 96], sizes = [2, 32], strides = [1, 1]} : vector<2x128xf32> to vector<2x32xf32>
    %210 = vector.extract_strided_slice %182 {offsets = [0, 64], sizes = [2, 32], strides = [1, 1]} : vector<2x128xf32> to vector<2x32xf32>
    %211 = math.tanh %210 : vector<2x32xf32>
    %212 = arith.mulf %208, %178 : vector<2x32xf32>
    %213 = arith.mulf %207, %211 : vector<2x32xf32>
    %214 = arith.addf %212, %213 : vector<2x32xf32>
    %215 = math.tanh %214 : vector<2x32xf32>
    %216 = arith.mulf %209, %215 : vector<2x32xf32>
    %cst_39 = arith.constant dense<0.000000e+00> : vector<2x128xf32>
    %217 = tpu.matmul %216, %24, %cst_39 {dimension_numbers = #tpu.dot_dimension_numbers<[1], [0], [0], [1], [0, 0, 1, 1], [], []>} : vector<2x32xf32>, vector<32x128xf32>, vector<2x128xf32> -> vector<2x128xf32>
    %218 = arith.addf %21, %217 : vector<2x128xf32>
    %cst_40 = arith.constant dense<0.000000e+00> : vector<2x128xf32>
    %219 = tpu.matmul %216, %25, %cst_40 {dimension_numbers = #tpu.dot_dimension_numbers<[1], [0], [0], [1], [0, 0, 1, 1], [], []>} : vector<2x32xf32>, vector<32x128xf32>, vector<2x128xf32> -> vector<2x128xf32>
    %cst_41 = arith.constant dense<0.000000e+00> : vector<2x128xf32>
    %220 = tpu.matmul %201, %26, %cst_41 {dimension_numbers = #tpu.dot_dimension_numbers<[1], [0], [0], [1], [0, 0, 1, 1], [], []>} : vector<2x32xf32>, vector<32x128xf32>, vector<2x128xf32> -> vector<2x128xf32>
    %221 = arith.addf %219, %220 : vector<2x128xf32>
    %222 = arith.addf %221, %29 : vector<2x128xf32>
    %223 = arith.negf %222 : vector<2x128xf32>
    %224 = math.exp %223 : vector<2x128xf32>
    %cst_42 = arith.constant 1.000000e+00 : f32
    %225 = vector.broadcast %cst_42 : f32 to vector<2x128xf32>
    %226 = arith.addf %225, %224 : vector<2x128xf32>
    %227 = arith.divf %225, %226 : vector<2x128xf32>
    %228 = vector.extract_strided_slice %227 {offsets = [0, 0], sizes = [2, 32], strides = [1, 1]} : vector<2x128xf32> to vector<2x32xf32>
    %229 = vector.extract_strided_slice %227 {offsets = [0, 32], sizes = [2, 32], strides = [1, 1]} : vector<2x128xf32> to vector<2x32xf32>
    %230 = vector.extract_strided_slice %227 {offsets = [0, 96], sizes = [2, 32], strides = [1, 1]} : vector<2x128xf32> to vector<2x32xf32>
    %231 = vector.extract_strided_slice %222 {offsets = [0, 64], sizes = [2, 32], strides = [1, 1]} : vector<2x128xf32> to vector<2x32xf32>
    %232 = math.tanh %231 : vector<2x32xf32>
    %233 = arith.mulf %229, %199 : vector<2x32xf32>
    %234 = arith.mulf %228, %232 : vector<2x32xf32>
    %235 = arith.addf %233, %234 : vector<2x32xf32>
    %236 = math.tanh %235 : vector<2x32xf32>
    %237 = arith.mulf %230, %236 : vector<2x32xf32>
    %238 = arith.negf %218 : vector<2x128xf32>
    %239 = math.exp %238 : vector<2x128xf32>
    %cst_43 = arith.constant 1.000000e+00 : f32
    %240 = vector.broadcast %cst_43 : f32 to vector<2x128xf32>
    %241 = arith.addf %240, %239 : vector<2x128xf32>
    %242 = arith.divf %240, %241 : vector<2x128xf32>
    %243 = vector.extract_strided_slice %242 {offsets = [0, 0], sizes = [2, 32], strides = [1, 1]} : vector<2x128xf32> to vector<2x32xf32>
    %244 = vector.extract_strided_slice %242 {offsets = [0, 32], sizes = [2, 32], strides = [1, 1]} : vector<2x128xf32> to vector<2x32xf32>
    %245 = vector.extract_strided_slice %242 {offsets = [0, 96], sizes = [2, 32], strides = [1, 1]} : vector<2x128xf32> to vector<2x32xf32>
    %246 = vector.extract_strided_slice %218 {offsets = [0, 64], sizes = [2, 32], strides = [1, 1]} : vector<2x128xf32> to vector<2x32xf32>
    %247 = math.tanh %246 : vector<2x32xf32>
    %248 = arith.mulf %244, %214 : vector<2x32xf32>
    %249 = arith.mulf %243, %247 : vector<2x32xf32>
    %250 = arith.addf %248, %249 : vector<2x32xf32>
    %251 = math.tanh %250 : vector<2x32xf32>
    %252 = arith.mulf %245, %251 : vector<2x32xf32>
    %cst_44 = arith.constant dense<0.000000e+00> : vector<2x128xf32>
    %253 = tpu.matmul %252, %24, %cst_44 {dimension_numbers = #tpu.dot_dimension_numbers<[1], [0], [0], [1], [0, 0, 1, 1], [], []>} : vector<2x32xf32>, vector<32x128xf32>, vector<2x128xf32> -> vector<2x128xf32>
    %254 = arith.addf %23, %253 : vector<2x128xf32>
    %cst_45 = arith.constant dense<0.000000e+00> : vector<2x128xf32>
    %255 = tpu.matmul %252, %25, %cst_45 {dimension_numbers = #tpu.dot_dimension_numbers<[1], [0], [0], [1], [0, 0, 1, 1], [], []>} : vector<2x32xf32>, vector<32x128xf32>, vector<2x128xf32> -> vector<2x128xf32>
    %cst_46 = arith.constant dense<0.000000e+00> : vector<2x128xf32>
    %256 = tpu.matmul %237, %26, %cst_46 {dimension_numbers = #tpu.dot_dimension_numbers<[1], [0], [0], [1], [0, 0, 1, 1], [], []>} : vector<2x32xf32>, vector<32x128xf32>, vector<2x128xf32> -> vector<2x128xf32>
    %257 = arith.addf %255, %256 : vector<2x128xf32>
    %258 = arith.addf %257, %29 : vector<2x128xf32>
    %259 = arith.negf %258 : vector<2x128xf32>
    %260 = math.exp %259 : vector<2x128xf32>
    %cst_47 = arith.constant 1.000000e+00 : f32
    %261 = vector.broadcast %cst_47 : f32 to vector<2x128xf32>
    %262 = arith.addf %261, %260 : vector<2x128xf32>
    %263 = arith.divf %261, %262 : vector<2x128xf32>
    %264 = vector.extract_strided_slice %263 {offsets = [0, 0], sizes = [2, 32], strides = [1, 1]} : vector<2x128xf32> to vector<2x32xf32>
    %265 = vector.extract_strided_slice %263 {offsets = [0, 32], sizes = [2, 32], strides = [1, 1]} : vector<2x128xf32> to vector<2x32xf32>
    %266 = vector.extract_strided_slice %263 {offsets = [0, 96], sizes = [2, 32], strides = [1, 1]} : vector<2x128xf32> to vector<2x32xf32>
    %267 = vector.extract_strided_slice %258 {offsets = [0, 64], sizes = [2, 32], strides = [1, 1]} : vector<2x128xf32> to vector<2x32xf32>
    %268 = math.tanh %267 : vector<2x32xf32>
    %269 = arith.mulf %265, %235 : vector<2x32xf32>
    %270 = arith.mulf %264, %268 : vector<2x32xf32>
    %271 = arith.addf %269, %270 : vector<2x32xf32>
    %272 = math.tanh %271 : vector<2x32xf32>
    %273 = arith.mulf %266, %272 : vector<2x32xf32>
    %274 = arith.negf %254 : vector<2x128xf32>
    %275 = math.exp %274 : vector<2x128xf32>
    %cst_48 = arith.constant 1.000000e+00 : f32
    %276 = vector.broadcast %cst_48 : f32 to vector<2x128xf32>
    %277 = arith.addf %276, %275 : vector<2x128xf32>
    %278 = arith.divf %276, %277 : vector<2x128xf32>
    %279 = vector.extract_strided_slice %278 {offsets = [0, 0], sizes = [2, 32], strides = [1, 1]} : vector<2x128xf32> to vector<2x32xf32>
    %280 = vector.extract_strided_slice %278 {offsets = [0, 32], sizes = [2, 32], strides = [1, 1]} : vector<2x128xf32> to vector<2x32xf32>
    %281 = vector.extract_strided_slice %278 {offsets = [0, 96], sizes = [2, 32], strides = [1, 1]} : vector<2x128xf32> to vector<2x32xf32>
    %282 = vector.extract_strided_slice %254 {offsets = [0, 64], sizes = [2, 32], strides = [1, 1]} : vector<2x128xf32> to vector<2x32xf32>
    %283 = math.tanh %282 : vector<2x32xf32>
    %284 = arith.mulf %280, %250 : vector<2x32xf32>
    %285 = arith.mulf %279, %283 : vector<2x32xf32>
    %286 = arith.addf %284, %285 : vector<2x32xf32>
    %287 = math.tanh %286 : vector<2x32xf32>
    %288 = arith.mulf %281, %287 : vector<2x32xf32>
    %cst_49 = arith.constant dense<0.000000e+00> : vector<2x128xf32>
    %289 = tpu.matmul %288, %25, %cst_49 {dimension_numbers = #tpu.dot_dimension_numbers<[1], [0], [0], [1], [0, 0, 1, 1], [], []>} : vector<2x32xf32>, vector<32x128xf32>, vector<2x128xf32> -> vector<2x128xf32>
    %cst_50 = arith.constant dense<0.000000e+00> : vector<2x128xf32>
    %290 = tpu.matmul %273, %26, %cst_50 {dimension_numbers = #tpu.dot_dimension_numbers<[1], [0], [0], [1], [0, 0, 1, 1], [], []>} : vector<2x32xf32>, vector<32x128xf32>, vector<2x128xf32> -> vector<2x128xf32>
    %291 = arith.addf %289, %290 : vector<2x128xf32>
    %292 = arith.addf %291, %29 : vector<2x128xf32>
    %293 = arith.negf %292 : vector<2x128xf32>
    %294 = math.exp %293 : vector<2x128xf32>
    %cst_51 = arith.constant 1.000000e+00 : f32
    %295 = vector.broadcast %cst_51 : f32 to vector<2x128xf32>
    %296 = arith.addf %295, %294 : vector<2x128xf32>
    %297 = arith.divf %295, %296 : vector<2x128xf32>
    %298 = vector.extract_strided_slice %297 {offsets = [0, 0], sizes = [2, 32], strides = [1, 1]} : vector<2x128xf32> to vector<2x32xf32>
    %299 = vector.extract_strided_slice %297 {offsets = [0, 32], sizes = [2, 32], strides = [1, 1]} : vector<2x128xf32> to vector<2x32xf32>
    %300 = vector.extract_strided_slice %297 {offsets = [0, 96], sizes = [2, 32], strides = [1, 1]} : vector<2x128xf32> to vector<2x32xf32>
    %301 = vector.extract_strided_slice %292 {offsets = [0, 64], sizes = [2, 32], strides = [1, 1]} : vector<2x128xf32> to vector<2x32xf32>
    %302 = math.tanh %301 : vector<2x32xf32>
    %303 = arith.mulf %299, %271 : vector<2x32xf32>
    %304 = arith.mulf %298, %302 : vector<2x32xf32>
    %305 = arith.addf %303, %304 : vector<2x32xf32>
    %306 = math.tanh %305 : vector<2x32xf32>
    %307 = arith.mulf %300, %306 : vector<2x32xf32>
    %c0_52 = arith.constant 0 : index
    %c0_53 = arith.constant 0 : index
    %308 = vector.load %arg8[%c0_52, %c0_53] : memref<32x32xf32, #tpu.memory_space<vmem>>, vector<32x32xf32>
    %cst_54 = arith.constant dense<0.000000e+00> : vector<2x32xf32>
    %309 = tpu.matmul %307, %308, %cst_54 {dimension_numbers = #tpu.dot_dimension_numbers<[1], [0], [0], [1], [0, 0, 1, 1], [], []>} : vector<2x32xf32>, vector<32x32xf32>, vector<2x32xf32> -> vector<2x32xf32>
    %c0_55 = arith.constant 0 : index
    %c0_56 = arith.constant 0 : index
    %310 = vector.load %arg9[%c0_55, %c0_56] : memref<1x32xf32, #tpu.memory_space<vmem>>, vector<1x32xf32>
    %311 = vector.broadcast %310 : vector<1x32xf32> to vector<2x32xf32>
    %312 = arith.addf %309, %311 : vector<2x32xf32>
    %cst_57 = arith.constant 0.000000e+00 : f32
    %313 = vector.broadcast %cst_57 : f32 to vector<2x32xf32>
    %314 = arith.maximumf %312, %313 : vector<2x32xf32>
    %c0_58 = arith.constant 0 : index
    %c0_59 = arith.constant 0 : index
    %315 = vector.load %arg10[%c0_58, %c0_59] : memref<1x32xf32, #tpu.memory_space<vmem>>, vector<1x32xf32>
    %316 = vector.broadcast %315 : vector<1x32xf32> to vector<2x32xf32>
    %317 = arith.mulf %314, %316 : vector<2x32xf32>
    %cst_60 = arith.constant dense<0.000000e+00> : vector<2xf32>
    %318 = vector.multi_reduction <add>, %317, %cst_60 [1] : vector<2x32xf32> to vector<2xf32>
    %319 = vector.shape_cast %318 : vector<2xf32> to vector<2x1xf32>
    %c0_61 = arith.constant 0 : index
    %c0_62 = arith.constant 0 : index
    %320 = vector.load %arg11[%c0_61, %c0_62] : memref<1x1xf32, #tpu.memory_space<vmem>>, vector<1x1xf32>
    %321 = vector.broadcast %320 : vector<1x1xf32> to vector<2x1xf32>
    %322 = arith.addf %319, %321 : vector<2x1xf32>
    %c0_63 = arith.constant 0 : index
    %c0_64 = arith.constant 0 : index
    %323 = vector.load %arg12[%c0_63, %c0_64] : memref<2x1xf32, #tpu.memory_space<vmem>>, vector<2x1xf32>
    tpu.vector_store %arg12[%c0_63, %c0_64], %322 {strides = array<i32>} : memref<2x1xf32, #tpu.memory_space<vmem>>, vector<2x1xf32>,
    return
  }
  func.func @transform_0(%arg0: i32) -> (i32, i32, i32) {
    %c0_i32 = arith.constant 0 : i32
    %c0_i32_0 = arith.constant 0 : i32
    %c0_i32_1 = arith.constant 0 : i32
    %c0_i32_2 = arith.constant 0 : i32
    return %c0_i32, %c0_i32_0, %c0_i32_1 : i32, i32, i32
  }
  func.func @transform_1(%arg0: i32) -> (i32, i32) {
    %c0_i32 = arith.constant 0 : i32
    %c0_i32_0 = arith.constant 0 : i32
    %c0_i32_1 = arith.constant 0 : i32
    return %c0_i32, %c0_i32_0 : i32, i32
  }
  func.func @transform_2(%arg0: i32) -> (i32, i32) {
    %c0_i32 = arith.constant 0 : i32
    %c0_i32_0 = arith.constant 0 : i32
    %c0_i32_1 = arith.constant 0 : i32
    return %c0_i32, %c0_i32_0 : i32, i32
  }
  func.func @transform_3(%arg0: i32) -> (i32, i32) {
    %c0_i32 = arith.constant 0 : i32
    %c0_i32_0 = arith.constant 0 : i32
    %c0_i32_1 = arith.constant 0 : i32
    return %c0_i32, %c0_i32_0 : i32, i32
  }
  func.func @transform_4(%arg0: i32) -> (i32, i32) {
    %c0_i32 = arith.constant 0 : i32
    %c0_i32_0 = arith.constant 0 : i32
    %c0_i32_1 = arith.constant 0 : i32
    return %c0_i32, %c0_i32_0 : i32, i32
  }
  func.func @transform_5(%arg0: i32) -> (i32, i32) {
    %c0_i32 = arith.constant 0 : i32
    %c0_i32_0 = arith.constant 0 : i32
    %c0_i32_1 = arith.constant 0 : i32
    return %c0_i32, %c0_i32_0 : i32, i32
  }
  func.func @transform_6(%arg0: i32) -> (i32, i32) {
    %c0_i32 = arith.constant 0 : i32
    %c0_i32_0 = arith.constant 0 : i32
    %c0_i32_1 = arith.constant 0 : i32
    return %c0_i32, %c0_i32_0 : i32, i32
  }
  func.func @transform_7(%arg0: i32) -> (i32, i32) {
    %c0_i32 = arith.constant 0 : i32
    %c0_i32_0 = arith.constant 0 : i32
    %c0_i32_1 = arith.constant 0 : i32
    return %c0_i32, %c0_i32_0 : i32, i32
  }
  func.func @transform_8(%arg0: i32) -> (i32, i32) {
    %c0_i32 = arith.constant 0 : i32
    %c0_i32_0 = arith.constant 0 : i32
    %c0_i32_1 = arith.constant 0 : i32
    return %c0_i32, %c0_i32_0 : i32, i32
  }
  func.func @transform_9(%arg0: i32) -> (i32, i32) {
    %c0_i32 = arith.constant 0 : i32
    %c0_i32_0 = arith.constant 0 : i32
    %c0_i32_1 = arith.constant 0 : i32
    return %c0_i32, %c0_i32_0 : i32, i32
  }
  func.func @transform_10(%arg0: i32) -> (i32, i32) {
    %c0_i32 = arith.constant 0 : i32
    %c0_i32_0 = arith.constant 0 : i32
    %c0_i32_1 = arith.constant 0 : i32
    return %c0_i32, %c0_i32_0 : i32, i32
  }
  func.func @transform_11(%arg0: i32) -> (i32, i32) {
    %c0_i32 = arith.constant 0 : i32
    %c0_i32_0 = arith.constant 0 : i32
    %c0_i32_1 = arith.constant 0 : i32
    return %c0_i32, %c0_i32_0 : i32, i32
  }
}

</mosaic_0001>

<bundles_post_ra>
// kernel: stock_lstm_forward.1
= control target key start
LH: loop header
LB: loop body
LE: loop exit
PB: predicated region body
PF: predicated region fallthrough
CT: control target
= control target key end

     0   :  { %s2726_s0 = inlined_call_operand.hbm [shape: f32[2,8,8], index: 0, kind: input, shape index: {}]   ;;  %s2727_s1 = inlined_call_operand.vmem [shape: f32[8,128], index: 1, kind: input, shape index: {}]   ;;  %s2728_s2 = inlined_call_operand.hbm [shape: f32[32,128], index: 2, kind: input, shape index: {}]   ;;  %s2729_s3 = inlined_call_operand.hbm [shape: f32[1,128], index: 3, kind: input, shape index: {}]   ;;  %s2730_s4 = inlined_call_operand.hbm [shape: f32[32,128], index: 4, kind: input, shape index: {}]   ;;  %s2731_s5 = inlined_call_operand.hbm [shape: f32[32,128], index: 5, kind: input, shape index: {}]   ;;  %s2732_s6 = inlined_call_operand.hbm [shape: f32[1,128], index: 6, kind: input, shape index: {}]   ;;  %s2733_s7 = inlined_call_operand.hbm [shape: f32[32,32], index: 7, kind: input, shape index: {}]   ;;  %s2734_s8 = inlined_call_operand.hbm [shape: f32[1,32], index: 8, kind: input, shape index: {}]   ;;  %s2735_s9 = inlined_call_operand.vmem [shape: f32[1,32], index: 9, kind: input, shape index: {}]   ;;  %s2736_s10 = inlined_call_operand.<no memory space> [shape: f32[1,1], index: 10, kind: input, shape index: {}]   ;;  %s2737_s11 = inlined_call_operand.vmem [shape: f32[2,1], index: 11, kind: output, shape index: {}]  }
   0x1   :  { %v16_v0 = vstv %s2736_s10 }
   0x2   :  { %17 = vst [vmem:[#allocation2] sm:$0x1] %v16_v0 }
   0x3   :  { %18 = vsyncpa [#allocation4], 0 }
   0x4   :  { %19 = vsyncpa [#allocation6], 0 }
   0x5   :  { %20 = vsyncpa [#allocation9], 0 }
   0x6   :  { %21 = vsyncpa [#allocation12], 0 }
   0x7   :  { %22 = vsyncpa [#allocation15], 0  ;;  %s42_s21 = sshll.u32 %s2728_s2, 4  ;;  %s2259_s22 = smov [#allocation5]   ;;  %s43_s21 = int_to_ptr.hbm [resolvable:$true] %s42_s21 }
   0x8   :  { %s44_s23 = sshll.u32 %s2259_s22, 4  ;;  %s66_s26 = sshll.u32 %s2730_s4, 4  ;;  %s45_s23 = int_to_ptr.vmem [resolvable:$true] %s44_s23  ;;  %s67_s26 = int_to_ptr.hbm [resolvable:$true] %s66_s26 }
   0x9   :  { %s2260_s27 = smov 128   ;;  %s2261_s10 = smov 8  }
   0xa   :  { %50 = dma.hbm_to_vmem [thread:$0]  %s43_s21, 512, %s45_s23, [#allocation6], %s2260_s27, %s2260_s27, %s2261_s10  }
   0xb   :  { %s2262_s28 = smov [#allocation8]   ;;  %s93_s2 = sshll.u32 %s2732_s6, 4  ;;  %s94_s2 = int_to_ptr.hbm [resolvable:$true] %s93_s2 }
   0xc   :  { %s68_s29 = sshll.u32 %s2262_s28, 4  ;;  %s27_s14 = sshll.u32 %s2726_s0, 4  ;;  %s69_s29 = int_to_ptr.vmem [resolvable:$true] %s68_s29  ;;  %s28_s14 = int_to_ptr.hbm [resolvable:$true] %s27_s14 }
   0xd   :  { %74 = dma.hbm_to_vmem [thread:$0]  %s67_s26, 512, %s69_s29, [#allocation9], %s2260_s27, %s2260_s27, %s2261_s10  }
   0xe   :  { %s2263_s15 = smov [#allocation11]   ;;  %s2264_s17 = smov [#allocation3]  }
   0xf   :  { %s95_s16 = sshll.u32 %s2263_s15, 4  ;;  %s29_s18 = sshll.u32 %s2264_s17, 4  ;;  %s96_s16 = int_to_ptr.vmem [resolvable:$true] %s95_s16  ;;  %s30_s18 = int_to_ptr.vmem [resolvable:$true] %s29_s18 }
  0x10   :  { %98 = dma.hbm_to_vmem [thread:$0]  %s94_s2, 16, %s96_s16, [#allocation12]  }
  0x11   :  { %s56_s6 = sshll.u32 %s2729_s3, 4  ;;  %s79_s0 = sshll.u32 %s2731_s5, 4  ;;  %s57_s6 = int_to_ptr.hbm [resolvable:$true] %s56_s6  ;;  %s80_s0 = int_to_ptr.hbm [resolvable:$true] %s79_s0 }
  0x12   :  { %35 = dma.hbm_to_vmem [thread:$0]  %s28_s14, 256, %s30_s18, [#allocation4], %s2260_s27, %s2260_s27, %s2261_s10  }
  0x13   :  { %s2265_s23 = smov [#allocation7]   ;;  %s2266_s25 = smov [#allocation10]  }
  0x14   :  { %s58_s24 = sshll.u32 %s2265_s23, 4  ;;  %s81_s26 = sshll.u32 %s2266_s25, 4  ;;  %s59_s24 = int_to_ptr.vmem [resolvable:$true] %s58_s24  ;;  %s82_s26 = int_to_ptr.vmem [resolvable:$true] %s81_s26 }
  0x15   :  { %61 = dma.hbm_to_vmem [thread:$0]  %s57_s6, 16, %s59_s24, [#allocation6]  }
  0x16   :  { %s103_s3 = sshll.u32 %s2733_s7, 4  ;;  %s117_s5 = sshll.u32 %s2734_s8, 4  ;;  %s104_s3 = int_to_ptr.hbm [resolvable:$true] %s103_s3  ;;  %s118_s5 = int_to_ptr.hbm [resolvable:$true] %s117_s5 }
  0x17   :  { %87 = dma.hbm_to_vmem [thread:$0]  %s80_s0, 512, %s82_s26, [#allocation9], %s2260_s27, %s2260_s27, %s2261_s10  }
  0x18   :  { %s2267_s2 = smov [#allocation13]   ;;  %s2268_s13 = smov [#allocation14]  }
  0x19   :  { %s105_s4 = sshll.u32 %s2267_s2, 4  ;;  %s119_s7 = sshll.u32 %s2268_s13, 4  ;;  %s106_s4 = int_to_ptr.vmem [resolvable:$true] %s105_s4  ;;  %s120_s7 = int_to_ptr.vmem [resolvable:$true] %s119_s7 }
  0x1a   :  { %111 = dma.hbm_to_vmem [thread:$0]  %s104_s3, 512, %s106_s4, [#allocation12], %s2260_s27, %s2260_s27, %s2261_s10  }
  0x1b   :  { %122 = dma.hbm_to_vmem [thread:$0]  %s118_s5, 16, %s120_s7, [#allocation15]  }
  0x1c   :  { %2249 = dma.done.wait [#allocation4], 256  }
  0x1d   :  { %2250 = vsyncadd [#allocation4], 4294967040 }
  0x1e   :  { %2251 = dma.done.wait [#allocation6], 528  }
  0x1f   :  { %2252 = vsyncadd [#allocation6], 4294966768 }
  0x20   :  { %2253 = dma.done.wait [#allocation9], 1024  }
  0x21   :  { %2254 = vsyncadd [#allocation9], 4294966272 }
  0x22   :  { %2255 = dma.done.wait [#allocation12], 528  }
  0x23   :  { %2256 = vsyncadd [#allocation12], 4294966768 }
  0x24   :  { %2257 = dma.done.wait [#allocation15], 16  }
  0x25   :  { %2258 = vsyncadd [#allocation15], 4294967280  ;;  %vm166_vm0 = vcmask 64512   ;;  %v161_v1 = vld [vmem:[%s2727_s1] sm:$0xff]  ;;  %v160_v3 = vld [vmem:[#allocation3 + $0x8] sm:$0xff]  ;;  %s2269_s27 = smov 64  }
  0x26   :  { %v159_v2 = vld [vmem:[#allocation3] sm:$0xff]  ;;  %188 = vmatpush.msra.mxu0 %v161_v1  ;;  %v1855_v5 = vld [vmem:[#allocation7] ss:$0 sm:$0xff]  ;;  %s2270_s1 = smov 96   ;;  %s2271_s10 = smov 32   ;;  %v2393_v44 = vld [vmem:[#allocation5 + $0x18] sm:$0xff] }
  0x27   :  { %1793 = vmatmul.msk.f32.vlgmr.msra.gmra.mxu0 %vm166_vm0, %v159_v2  ;;  %v2395_v45 = vld [vmem:[#allocation8 + $0x18] sm:$0xff]  ;;  %v2397_v46 = vld [vmem:[#allocation5 + $0x10] sm:$0xff]  ;;  %296 = vmatpush.msra.mxu1 %v2393_v44  ;;  %v2403_v48 = vld [vmem:[#allocation5 + $0x8] sm:$0xff]  ;;  %vm277_vm9 = vcmask 1041409   ;;  %vm281_vm10 = vcmask 261120  }
  0x28   :  { %322 = vmatpush.msra.mxu2 %v2395_v45  ;;  %v2401_v47 = vld [vmem:[#allocation8 + $0x10] sm:$0xff]  ;;  %v2405_v49 = vld [vmem:[#allocation8 + $0x8] sm:$0xff]  ;;  %465 = vmatpush.msra.mxu3 %v2393_v44  ;;  %v2410_v50 = vld [vmem:[#allocation5] sm:$0xff] }
  0x29   :  { %297 = vmatpush.msra.mxu1 %v2397_v46  ;;  %v2412_v51 = vld [vmem:[#allocation8] sm:$0xff] }
  0x2a   :  { %323 = vmatpush.msra.mxu2 %v2401_v47  ;;  %466 = vmatpush.msra.mxu3 %v2397_v46  ;;  %v2441_v1 = vld [vmem:[#allocation11] ss:$0 sm:$0xff] }
  0x2b   :  { %298 = vmatpush.msra.mxu1 %v2403_v48 }
  0x2c   :  { %324 = vmatpush.msra.mxu2 %v2405_v49  ;;  %467 = vmatpush.msra.mxu3 %v2403_v48 }
  0x2d   :  { %299 = vmatpush.msra.mxu1 %v2410_v50 }
  0x2e   :  { %325 = vmatpush.msra.mxu2 %v2412_v51  ;;  %468 = vmatpush.msra.mxu3 %v2410_v50 }
  0x2f   :  { %1794 = vmatmul.msk.f32.gmra.mxu0 %vm166_vm0, %v160_v3 }
  0x30   :  { %517 = vmatpush.msrb.mxu2 %v2395_v45  ;;  %668 = vmatpush.msrb.mxu3 %v2393_v44 }
  0x32   :  { %518 = vmatpush.msrb.mxu2 %v2401_v47  ;;  %669 = vmatpush.msrb.mxu3 %v2397_v46 }
  0x34   :  { %519 = vmatpush.msrb.mxu2 %v2405_v49  ;;  %670 = vmatpush.msrb.mxu3 %v2403_v48 }
  0x36   :  { %520 = vmatpush.msrb.mxu2 %v2412_v51  ;;  %671 = vmatpush.msrb.mxu3 %v2410_v50 }
  0xa4   :  { %v190_v4 = vpop.f32.mrf.mxu0 }
  0xa5   :  { %v2380_v8 = vadd.f32 %v1855_v5, %v190_v4 }
  0xa7   :  { %v1795_v12 = vmul.f32 -1.442695, %v2380_v8 }
  0xac   :  { %v193_v6 = vpop.f32.mrf.mxu0 }
  0xad   :  { %v2377_v7 = vadd.f32 %v1855_v5, %v193_v6 }
  0xaf   :  { %1860 = vtanh.f32 %v2377_v7  ;;  %v1796_v11 = vmul.f32 -1.442695, %v2377_v7 }
  0xb0   :  { %1862 = vtanh.f32 %v2380_v8 }
  0xb1   :  { %1864 = vpow2.f32 %v1796_v11 }
  0xb2   :  { %1866 = vpow2.f32 %v1795_v12 }
  0xb5   :  { %v1861_v9 = vpop.eup %1860 }
  0xb6   :  { %256 = vrot.lane.b32.xlu0 %v1861_v9, %s2269_s27  ;;  %v1863_v10 = vpop.eup %1862 }
  0xb7   :  { %v1865_v13 = vpop.eup %1864 }
  0xb8   :  { %v219_v14 = vadd.f32 1.0, %v1865_v13  ;;  %v1867_v15 = vpop.eup %1866 }
  0xb9   :  { %v218_v16 = vadd.f32 1.0, %v1867_v15 }
  0xba   :  { %1868 = vrcp.f32 %v219_v14  ;;  %v246_v25 = vand.u32 2147483648, %v219_v14  ;;  %vm240_vm2 = vweird.f32 %v219_v14  ;;  %v244_v26 = vand.u32 2147483647, %v219_v14 }
  0xbb   :  { %1870 = vrcp.f32 %v218_v16  ;;  %v231_v34 = vand.u32 2147483648, %v218_v16  ;;  %vm225_vm6 = vweird.f32 %v218_v16  ;;  %v229_v35 = vand.u32 2147483647, %v218_v16 }
  0xbc   :  { %v247_v29 = vor.u32 1.1754944e-38, %v246_v25  ;;  %vm245_vm4 = vcmp.eq.f32.partialorder %v244_v26, 8.507059e+37 }
  0xbd   :  { %v232_v37 = vor.u32 1.1754944e-38, %v231_v34  ;;  %vm230_vm8 = vcmp.eq.f32.partialorder %v229_v35, 8.507059e+37 }
  0xbe   :  { %254 = vrot.lane.b32.xlu0 %v1863_v10, %s2269_s27 }
  0xc0   :  { %v1869_v17 = vpop.eup %1868 }
  0xc1   :  { %v236_v18 = vmul.f32 %v1869_v17, %v219_v14  ;;  %v1871_v20 = vpop.eup %1870  ;;  %vm241_vm1 = vweird.f32 %v1869_v17 }
  0xc2   :  { %v221_v22 = vmul.f32 %v1871_v20, %v218_v16  ;;  %vm242_vm3 = vmor %vm240_vm2, %vm241_vm1  ;;  %vm226_vm5 = vweird.f32 %v1871_v20 }
  0xc3   :  { %v237_v19 = vsub.f32 1.0, %v236_v18  ;;  %vm227_vm7 = vmor %vm225_vm6, %vm226_vm5 }
  0xc4   :  { %v222_v24 = vsub.f32 1.0, %v221_v22 }
  0xc5   :  { %v238_v21 = vmul.f32 %v1869_v17, %v237_v19 }
  0xc6   :  { %v223_v28 = vmul.f32 %v1871_v20, %v222_v24 }
  0xc7   :  { %v239_v23 = vadd.f32 %v1869_v17, %v238_v21 }
  0xc8   :  { %v224_v33 = vadd.f32 %v1871_v20, %v223_v28 }
  0xc9   :  { %v243_v27 = vsel %vm242_vm3, %v1869_v17, %v239_v23 }
  0xca   :  { %v248_v31 = vsel %vm245_vm4, %v247_v29, %v243_v27  ;;  %v228_v36 = vsel %vm227_vm7, %v1871_v20, %v224_v33 }
  0xcb   :  { %v233_v39 = vsel %vm230_vm8, %v232_v37, %v228_v36 }
 0x128   :  { %v257_v30 = vpop.permute.xlu0 %256 }
 0x129   :  { %v2387_v32 = vmul.f32 %v257_v30, %v248_v31 }
 0x12b   :  { %1872 = vtanh.f32 %v2387_v32  ;;  %v404_v4 = vrot.slane %v2387_v32, 7 }
 0x130   :  { %v255_v38 = vpop.permute.xlu0 %254 }
 0x131   :  { %v1873_v40 = vpop.eup %1872  ;;  %v260_v41 = vmul.f32 %v255_v38, %v233_v39 }
 0x132   :  { %268 = vrot.lane.b32.xlu1 %v1873_v40, %s2270_s1 }
 0x133   :  { %1874 = vtanh.f32 %v260_v41  ;;  %v403_v43 = vrot.slane %v260_v41, 7 }
 0x139   :  { %v1875_v42 = vpop.eup %1874 }
 0x13a   :  { %266 = vrot.lane.b32.xlu1 %v1875_v42, %s2270_s1 }
 0x142   :  { %405 = vrot.lane.b32.xlu1 %v403_v43, %s2271_s10 }
 0x1a4   :  { %v269_v52 = vpop.permute.xlu1 %268 }
 0x1a5   :  { %v273_v53 = vmul.f32 %v269_v52, %v248_v31 }
 0x1a7   :  { %v276_v55 = vrot.slane %v273_v53, 7 }
 0x1ac   :  { %v267_v54 = vpop.permute.xlu1 %266 }
 0x1ad   :  { %v272_v56 = vmul.f32 %v267_v54, %v233_v39 }
 0x1af   :  { %v278_v57 = vsel %vm277_vm9, %v276_v55, %v272_v56 }
 0x1b0   :  { %279 = vrot.lane.b32.xlu2 %v278_v57, %s2271_s10 }
 0x20a   :  { %v280_v58 = vpop.permute.xlu2 %279 }
 0x20b   :  { %1797 = vmatmul.msk.f32.vlgmr.msra.gmra.mxu1 %vm281_vm10, %v280_v58  ;;  %1798 = vmatmul.msk.f32.vlgmr.msra.gmra.mxu2 %vm281_vm10, %v280_v58 }
 0x20c   :  { %867 = vmatpush.msra.mxu2 %v2393_v44 }
 0x20e   :  { %868 = vmatpush.msra.mxu2 %v2397_v46 }
 0x210   :  { %869 = vmatpush.msra.mxu2 %v2403_v48 }
 0x212   :  { %870 = vmatpush.msra.mxu2 %v2410_v50 }
 0x288   :  { %v301_v59 = vpop.f32.mrf.mxu1 }
 0x289   :  { %v305_v60 = vrot.slane %v301_v59, 7  ;;  %v309_v61 = vadd.f32 %v301_v59, %v2377_v7 }
 0x28b   :  { %v308_v62 = vadd.f32 %v305_v60, %v2380_v8  ;;  %1876 = vtanh.f32 %v309_v61  ;;  %v1801_v12 = vmul.f32 -1.442695, %v309_v61 }
 0x28d   :  { %1878 = vtanh.f32 %v308_v62  ;;  %v1800_v6 = vmul.f32 -1.442695, %v308_v62 }
 0x28e   :  { %v327_v2 = vpop.f32.mrf.mxu2 }
 0x28f   :  { %v328_v3 = vadd.f32 %v2441_v1, %v327_v2 }
 0x291   :  { %v1877_v63 = vpop.eup %1876  ;;  %1880 = vtanh.f32 %v328_v3  ;;  %v1799_v11 = vmul.f32 -1.442695, %v328_v3 }
 0x292   :  { %417 = vrot.lane.b32.xlu0 %v1877_v63, %s2269_s27  ;;  %1882 = vpow2.f32 %v1800_v6  ;;  %v406_v63 = vpop.permute.xlu1 %405 }
 0x293   :  { %v1879_v0 = vpop.eup %1878 }
 0x294   :  { %415 = vrot.lane.b32.xlu2 %v1879_v0, %s2269_s27 }
 0x297   :  { %v1881_v5 = vpop.eup %1880 }
 0x298   :  { %v1883_v9 = vpop.eup %1882 }
 0x299   :  { %v367_v10 = vadd.f32 1.0, %v1883_v9 }
 0x29b   :  { %1884 = vrcp.f32 %v367_v10  ;;  %v380_v23 = vand.u32 2147483648, %v367_v10  ;;  %vm374_vm12 = vweird.f32 %v367_v10  ;;  %v378_v24 = vand.u32 2147483647, %v367_v10 }
 0x29c   :  { %407 = vrot.lane.b32.xlu2 %v404_v4, %s2271_s10  ;;  %1886 = vpow2.f32 %v1799_v11 }
 0x29d   :  { %1888 = vpow2.f32 %v1801_v12  ;;  %v381_v27 = vor.u32 1.1754944e-38, %v380_v23  ;;  %vm379_vm14 = vcmp.eq.f32.partialorder %v378_v24, 8.507059e+37 }
 0x2a1   :  { %v1885_v13 = vpop.eup %1884 }
 0x2a2   :  { %v1887_v14 = vpop.eup %1886  ;;  %v370_v15 = vmul.f32 %v1885_v13, %v367_v10  ;;  %vm375_vm11 = vweird.f32 %v1885_v13 }
 0x2a3   :  { %v333_v16 = vadd.f32 1.0, %v1887_v14  ;;  %v1889_v18 = vpop.eup %1888  ;;  %vm376_vm13 = vmor %vm374_vm12, %vm375_vm11  ;;  %v2468_v14 = vld [vmem:[#allocation10 + $0x10] sm:$0xff] }
 0x2a4   :  { %351 = vrot.lane.b32.xlu2 %v1881_v5, %s2269_s27  ;;  %v371_v17 = vsub.f32 1.0, %v370_v15  ;;  %v368_v19 = vadd.f32 1.0, %v1889_v18  ;;  %v2473_v15 = vld [vmem:[#allocation10 + $0x8] sm:$0xff] }
 0x2a5   :  { %1890 = vrcp.f32 %v333_v16  ;;  %v345_v39 = vand.u32 2147483648, %v333_v16  ;;  %vm339_vm0 = vweird.f32 %v333_v16  ;;  %v343_v40 = vand.u32 2147483647, %v333_v16 }
 0x2a6   :  { %v372_v20 = vmul.f32 %v1885_v13, %v371_v17  ;;  %1892 = vrcp.f32 %v368_v19  ;;  %v395_v52 = vand.u32 2147483648, %v368_v19  ;;  %vm389_vm4 = vweird.f32 %v368_v19 }
 0x2a7   :  { %v346_v43 = vor.u32 1.1754944e-38, %v345_v39  ;;  %vm344_vm3 = vcmp.eq.f32.partialorder %v343_v40, 8.507059e+37  ;;  %v393_v53 = vand.u32 2147483647, %v368_v19 }
 0x2a8   :  { %v373_v21 = vadd.f32 %v1885_v13, %v372_v20  ;;  %v396_v58 = vor.u32 1.1754944e-38, %v395_v52 }
 0x2a9   :  { %vm394_vm6 = vcmp.eq.f32.partialorder %v393_v53, 8.507059e+37 }
 0x2aa   :  { %v377_v25 = vsel %vm376_vm13, %v1885_v13, %v373_v21  ;;  %v2466_v13 = vld [vmem:[#allocation10 + $0x18] sm:$0xff] }
 0x2ab   :  { %v1891_v22 = vpop.eup %1890  ;;  %v2447_v30 = vsel %vm379_vm14, %v381_v27, %v377_v25  ;;  %497 = vmatpush.msrb.mxu1 %v2466_v13  ;;  %700 = vmatpush.msrb.mxu0 %v2466_v13 }
 0x2ac   :  { %v335_v26 = vmul.f32 %v1891_v22, %v333_v16  ;;  %v1893_v28 = vpop.eup %1892  ;;  %vm340_vm15 = vweird.f32 %v1891_v22  ;;  %v411_v0 = vmul.f32 %v406_v63, %v2447_v30  ;;  %v2476_v16 = vld [vmem:[#allocation10] sm:$0xff] }
 0x2ad   :  { %v385_v33 = vmul.f32 %v1893_v28, %v368_v19  ;;  %vm341_vm1 = vmor %vm339_vm0, %vm340_vm15  ;;  %vm390_vm2 = vweird.f32 %v1893_v28  ;;  %498 = vmatpush.msrb.mxu1 %v2468_v14  ;;  %701 = vmatpush.msrb.mxu0 %v2468_v14 }
 0x2ae   :  { %v336_v32 = vsub.f32 1.0, %v335_v26  ;;  %vm391_vm5 = vmor %vm389_vm4, %vm390_vm2 }
 0x2af   :  { %v386_v35 = vsub.f32 1.0, %v385_v33  ;;  %499 = vmatpush.msrb.mxu1 %v2473_v15  ;;  %702 = vmatpush.msrb.mxu0 %v2473_v15 }
 0x2b0   :  { %v337_v34 = vmul.f32 %v1891_v22, %v336_v32 }
 0x2b1   :  { %v387_v38 = vmul.f32 %v1893_v28, %v386_v35  ;;  %500 = vmatpush.msrb.mxu1 %v2476_v16  ;;  %703 = vmatpush.msrb.mxu0 %v2476_v16 }
 0x2b2   :  { %v338_v37 = vadd.f32 %v1891_v22, %v337_v34 }
 0x2b3   :  { %v388_v42 = vadd.f32 %v1893_v28, %v387_v38  ;;  %720 = vmatpush.msra.mxu1 %v2395_v45  ;;  %919 = vmatpush.msra.mxu0 %v2395_v45 }
 0x2b4   :  { %v342_v41 = vsel %vm341_vm1, %v1891_v22, %v338_v37 }
 0x2b5   :  { %v347_v54 = vsel %vm344_vm3, %v346_v43, %v342_v41  ;;  %v392_v57 = vsel %vm391_vm5, %v1893_v28, %v388_v42  ;;  %721 = vmatpush.msra.mxu1 %v2401_v47  ;;  %920 = vmatpush.msra.mxu0 %v2401_v47 }
 0x2b6   :  { %v397_v59 = vsel %vm394_vm6, %v396_v58, %v392_v57 }
 0x2b7   :  { %722 = vmatpush.msra.mxu1 %v2405_v49  ;;  %921 = vmatpush.msra.mxu0 %v2405_v49 }
 0x2b9   :  { %723 = vmatpush.msra.mxu1 %v2412_v51  ;;  %922 = vmatpush.msra.mxu0 %v2412_v51 }
 0x2ee   :  { %v416_v29 = vpop.permute.xlu2 %415 }
 0x2ef   :  { %v421_v31 = vmul.f32 %v416_v29, %v2447_v30 }
 0x2f1   :  { %425 = vrot.lane.b32.xlu0 %v421_v31, %s2271_s10 }
 0x2f6   :  { %v408_v36 = vpop.permute.xlu2 %407 }
 0x2f7   :  { %v412_v5 = vmul.f32 %v408_v36, %v397_v59 }
 0x2fe   :  { %v352_v55 = vpop.permute.xlu2 %351 }
 0x2ff   :  { %v2451_v56 = vmul.f32 %v352_v55, %v347_v54 }
 0x301   :  { %1894 = vtanh.f32 %v2451_v56 }
 0x304   :  { %v418_v60 = vpop.permute.xlu0 %417 }
 0x305   :  { %v422_v61 = vmul.f32 %v418_v60, %v397_v59 }
 0x307   :  { %427 = vrot.lane.b32.xlu1 %v422_v61, %s2271_s10  ;;  %v1895_v62 = vpop.eup %1894 }
 0x308   :  { %357 = vrot.lane.b32.xlu2 %v1895_v62, %s2270_s1 }
 0x362   :  { %v358_v11 = vpop.permute.xlu2 %357 }
 0x363   :  { %v426_v2 = vpop.permute.xlu0 %425  ;;  %v360_v12 = vmul.f32 %v358_v11, %v347_v54 }
 0x364   :  { %v2457_v3 = vadd.f32 %v426_v2, %v411_v0 }
 0x366   :  { %1896 = vtanh.f32 %v2457_v3 }
 0x36c   :  { %v1897_v4 = vpop.eup %1896 }
 0x36d   :  { %437 = vrot.lane.b32.xlu0 %v1897_v4, %s2269_s27 }
 0x379   :  { %v428_v6 = vpop.permute.xlu1 %427 }
 0x37a   :  { %v2461_v9 = vadd.f32 %v428_v6, %v412_v5 }
 0x37c   :  { %1898 = vtanh.f32 %v2461_v9 }
 0x382   :  { %v1899_v10 = vpop.eup %1898 }
 0x383   :  { %439 = vrot.lane.b32.xlu1 %v1899_v10, %s2269_s27 }
 0x38b   :  { %481 = vrot.lane.b32.xlu1 %v360_v12, %s2271_s10 }
 0x3df   :  { %v438_v17 = vpop.permute.xlu0 %437 }
 0x3e0   :  { %v443_v18 = vmul.f32 %v438_v17, %v2447_v30 }
 0x3e2   :  { %v447_v20 = vrot.slane %v443_v18, 1 }
 0x3f5   :  { %v440_v19 = vpop.permute.xlu1 %439 }
 0x3f6   :  { %v444_v21 = vmul.f32 %v440_v19, %v397_v59 }
 0x3f8   :  { %v448_v22 = vsel %vm277_vm9, %v444_v21, %v447_v20 }
 0x3f9   :  { %449 = vrot.lane.b32.xlu0 %v448_v22, %s2271_s10 }
 0x3fd   :  { %v482_v23 = vpop.permute.xlu1 %481 }
 0x3fe   :  { %1803 = vmatmul.msk.f32.vlgmr.msrb.gmra.mxu1 %vm281_vm10, %v482_v23 }
 0x3ff   :  { %1066 = vmatpush.msrb.mxu1 %v2393_v44 }
 0x401   :  { %1067 = vmatpush.msrb.mxu1 %v2397_v46 }
 0x403   :  { %1068 = vmatpush.msrb.mxu1 %v2403_v48 }
 0x405   :  { %1069 = vmatpush.msrb.mxu1 %v2410_v50 }
 0x46b   :  { %v450_v24 = vpop.permute.xlu0 %449 }
 0x46c   :  { %1802 = vmatmul.msk.f32.vlgmr.msra.gmra.mxu3 %vm281_vm10, %v450_v24  ;;  %1804 = vmatmul.msk.f32.vlgmr.msrb.gmra.mxu2 %vm281_vm10, %v450_v24 }
 0x46d   :  { %899 = vmatpush.msra.mxu3 %v2466_v13  ;;  %1098 = vmatpush.msrb.mxu2 %v2466_v13 }
 0x46f   :  { %900 = vmatpush.msra.mxu3 %v2468_v14  ;;  %1099 = vmatpush.msrb.mxu2 %v2468_v14 }
 0x471   :  { %901 = vmatpush.msra.mxu3 %v2473_v15  ;;  %1100 = vmatpush.msrb.mxu2 %v2473_v15 }
 0x473   :  { %902 = vmatpush.msra.mxu3 %v2476_v16  ;;  %1101 = vmatpush.msrb.mxu2 %v2476_v16 }
 0x47b   :  { %v502_v27 = vpop.f32.mrf.mxu1 }
 0x4ef   :  { %v470_v25 = vpop.f32.mrf.mxu3  ;;  %v522_v26 = vpop.f32.mrf.mxu2 }
 0x4f0   :  { %v474_v28 = vrot.slane %v470_v25, 6  ;;  %v475_v29 = vrot.slane %v470_v25, 7  ;;  %v523_v30 = vadd.f32 %v522_v26, %v502_v27 }
 0x4f2   :  { %v478_v31 = vadd.f32 %v474_v28, %v2380_v8  ;;  %v479_v32 = vadd.f32 %v475_v29, %v2377_v7  ;;  %v525_v33 = vadd.f32 %v2441_v1, %v523_v30 }
 0x4f4   :  { %1900 = vtanh.f32 %v478_v31  ;;  %v1806_v37 = vmul.f32 -1.442695, %v478_v31  ;;  %v1807_v41 = vmul.f32 -1.442695, %v479_v32  ;;  %v1805_v43 = vmul.f32 -1.442695, %v525_v33 }
 0x4f5   :  { %1902 = vtanh.f32 %v479_v32 }
 0x4f6   :  { %1904 = vtanh.f32 %v525_v33 }
 0x4f7   :  { %1906 = vpow2.f32 %v1806_v37 }
 0x4fa   :  { %v1901_v34 = vpop.eup %1900 }
 0x4fb   :  { %v1903_v35 = vpop.eup %1902  ;;  %617 = vrot.lane.b32.xlu2 %v1901_v34, %s2269_s27 }
 0x4fc   :  { %619 = vrot.lane.b32.xlu0 %v1903_v35, %s2269_s27  ;;  %v1905_v36 = vpop.eup %1904  ;;  %v609_v35 = vrot.slane %v2457_v3, 7  ;;  %v610_v3 = vrot.slane %v2461_v9, 7 }
 0x4fd   :  { %552 = vrot.lane.b32.xlu1 %v1905_v36, %s2269_s27  ;;  %v1907_v38 = vpop.eup %1906 }
 0x4fe   :  { %v573_v39 = vadd.f32 1.0, %v1907_v38 }
 0x500   :  { %1908 = vrcp.f32 %v573_v39  ;;  %v586_v59 = vand.u32 2147483648, %v573_v39  ;;  %vm580_vm8 = vweird.f32 %v573_v39 }
 0x501   :  { %1910 = vpow2.f32 %v1807_v41 }
 0x502   :  { %1912 = vpow2.f32 %v1805_v43  ;;  %v587_v62 = vor.u32 1.1754944e-38, %v586_v59 }
 0x505   :  { %547 = vrot.lane.b32.xlu1 %v2451_v56, %s2271_s10  ;;  %v584_v56 = vand.u32 2147483647, %v573_v39 }
 0x506   :  { %v1909_v40 = vpop.eup %1908 }
 0x507   :  { %v576_v42 = vmul.f32 %v1909_v40, %v573_v39  ;;  %v1911_v54 = vpop.eup %1910  ;;  %vm581_vm7 = vweird.f32 %v1909_v40  ;;  %vm585_vm12 = vcmp.eq.f32.partialorder %v584_v56, 8.507059e+37 }
 0x508   :  { %v574_v55 = vadd.f32 1.0, %v1911_v54  ;;  %v1913_v58 = vpop.eup %1912  ;;  %vm582_vm11 = vmor %vm580_vm8, %vm581_vm7 }
 0x509   :  { %v577_v52 = vsub.f32 1.0, %v576_v42  ;;  %v529_v60 = vadd.f32 1.0, %v1913_v58 }
 0x50a   :  { %1914 = vrcp.f32 %v574_v55  ;;  %v601_v20 = vand.u32 2147483648, %v574_v55  ;;  %vm595_vm14 = vweird.f32 %v574_v55  ;;  %v599_v21 = vand.u32 2147483647, %v574_v55 }
 0x50b   :  { %v578_v53 = vmul.f32 %v1909_v40, %v577_v52  ;;  %1916 = vrcp.f32 %v529_v60  ;;  %v541_v25 = vand.u32 2147483648, %v529_v60  ;;  %vm535_vm2 = vweird.f32 %v529_v60 }
 0x50c   :  { %v602_v24 = vor.u32 1.1754944e-38, %v601_v20  ;;  %vm600_vm1 = vcmp.eq.f32.partialorder %v599_v21, 8.507059e+37  ;;  %v539_v26 = vand.u32 2147483647, %v529_v60 }
 0x50d   :  { %v579_v57 = vadd.f32 %v1909_v40, %v578_v53  ;;  %v542_v31 = vor.u32 1.1754944e-38, %v541_v25 }
 0x50e   :  { %vm540_vm4 = vcmp.eq.f32.partialorder %v539_v26, 8.507059e+37 }
 0x50f   :  { %v583_v61 = vsel %vm582_vm11, %v1909_v40, %v579_v57 }
 0x510   :  { %v2516_v0 = vsel %vm585_vm12, %v587_v62, %v583_v61  ;;  %v1915_v4 = vpop.eup %1914 }
 0x511   :  { %v591_v5 = vmul.f32 %v1915_v4, %v574_v55  ;;  %v1917_v6 = vpop.eup %1916  ;;  %vm596_vm13 = vweird.f32 %v1915_v4  ;;  %v613_v36 = vmul.f32 %v609_v35, %v2516_v0 }
 0x512   :  { %v531_v11 = vmul.f32 %v1917_v6, %v529_v60  ;;  %vm597_vm15 = vmor %vm595_vm14, %vm596_vm13  ;;  %vm536_vm0 = vweird.f32 %v1917_v6 }
 0x513   :  { %v592_v10 = vsub.f32 1.0, %v591_v5  ;;  %vm537_vm3 = vmor %vm535_vm2, %vm536_vm0 }
 0x514   :  { %v532_v17 = vsub.f32 1.0, %v531_v11 }
 0x515   :  { %v593_v12 = vmul.f32 %v1915_v4, %v592_v10 }
 0x516   :  { %v533_v19 = vmul.f32 %v1917_v6, %v532_v17 }
 0x517   :  { %v594_v18 = vadd.f32 %v1915_v4, %v593_v12 }
 0x518   :  { %v534_v23 = vadd.f32 %v1917_v6, %v533_v19 }
 0x519   :  { %v598_v22 = vsel %vm597_vm15, %v1915_v4, %v594_v18 }
 0x51a   :  { %v603_v28 = vsel %vm600_vm1, %v602_v24, %v598_v22  ;;  %v538_v30 = vsel %vm537_vm3, %v1917_v6, %v534_v23 }
 0x51b   :  { %v543_v33 = vsel %vm540_vm4, %v542_v31, %v538_v30  ;;  %v614_v53 = vmul.f32 %v610_v3, %v603_v28 }
 0x555   :  { %v618_v63 = vpop.permute.xlu2 %617 }
 0x556   :  { %v623_v2 = vmul.f32 %v618_v63, %v2516_v0 }
 0x558   :  { %627 = vrot.lane.b32.xlu2 %v623_v2, %s2271_s10 }
 0x56e   :  { %v620_v27 = vpop.permute.xlu0 %619 }
 0x56f   :  { %v624_v29 = vmul.f32 %v620_v27, %v603_v28  ;;  %v553_v32 = vpop.permute.xlu1 %552 }
 0x570   :  { %v555_v34 = vmul.f32 %v553_v32, %v543_v33 }
 0x571   :  { %629 = vrot.lane.b32.xlu0 %v624_v29, %s2271_s10 }
 0x572   :  { %557 = vrot.lane.b32.xlu2 %v555_v34, %s2271_s10 }
 0x577   :  { %v548_v40 = vpop.permute.xlu1 %547 }
 0x578   :  { %v550_v41 = vmul.f32 %v548_v40, %v543_v33 }
 0x5b2   :  { %v628_v37 = vpop.permute.xlu2 %627 }
 0x5b3   :  { %v2524_v38 = vadd.f32 %v628_v37, %v613_v36 }
 0x5b5   :  { %1918 = vtanh.f32 %v2524_v38 }
 0x5bb   :  { %v1919_v39 = vpop.eup %1918 }
 0x5bc   :  { %639 = vrot.lane.b32.xlu0 %v1919_v39, %s2269_s27 }
 0x5cc   :  { %v558_v42 = vpop.permute.xlu2 %557 }
 0x5cd   :  { %v2528_v43 = vadd.f32 %v558_v42, %v550_v41 }
 0x5cf   :  { %1920 = vtanh.f32 %v2528_v43 }
 0x5d5   :  { %v1921_v52 = vpop.eup %1920 }
 0x5d6   :  { %563 = vrot.lane.b32.xlu2 %v1921_v52, %s2269_s27 }
 0x5e3   :  { %v630_v54 = vpop.permute.xlu0 %629 }
 0x5e4   :  { %v2533_v55 = vadd.f32 %v630_v54, %v614_v53 }
 0x5e6   :  { %1922 = vtanh.f32 %v2533_v55 }
 0x5ec   :  { %v1923_v57 = vpop.eup %1922 }
 0x5ed   :  { %641 = vrot.lane.b32.xlu1 %v1923_v57, %s2269_s27 }
 0x62e   :  { %v640_v56 = vpop.permute.xlu0 %639 }
 0x62f   :  { %v645_v60 = vmul.f32 %v640_v56, %v2516_v0 }
 0x630   :  { %v564_v58 = vpop.permute.xlu2 %563 }
 0x631   :  { %v566_v59 = vmul.f32 %v564_v58, %v543_v33  ;;  %v649_v63 = vrot.slane %v645_v60, 2 }
 0x633   :  { %684 = vrot.lane.b32.xlu1 %v566_v59, %s2271_s10 }
 0x65f   :  { %v642_v61 = vpop.permute.xlu1 %641 }
 0x660   :  { %v646_v62 = vmul.f32 %v642_v61, %v603_v28 }
 0x662   :  { %v650_v9 = vrot.slane %v646_v62, 1 }
 0x664   :  { %v651_v2 = vsel %vm277_vm9, %v650_v9, %v649_v63 }
 0x665   :  { %652 = vrot.lane.b32.xlu0 %v651_v2, %s2271_s10 }
 0x6a5   :  { %v685_v4 = vpop.permute.xlu1 %684 }
 0x6a6   :  { %1809 = vmatmul.msk.f32.vlgmr.msrb.gmra.mxu0 %vm281_vm10, %v685_v4 }
 0x6a7   :  { %1265 = vmatpush.msrb.mxu0 %v2393_v44 }
 0x6a9   :  { %1266 = vmatpush.msrb.mxu0 %v2397_v46 }
 0x6ab   :  { %1267 = vmatpush.msrb.mxu0 %v2403_v48 }
 0x6ad   :  { %1268 = vmatpush.msrb.mxu0 %v2410_v50 }
 0x6d7   :  { %v653_v0 = vpop.permute.xlu0 %652 }
 0x6d8   :  { %1808 = vmatmul.msk.f32.vlgmr.msrb.gmra.mxu3 %vm281_vm10, %v653_v0  ;;  %1810 = vmatmul.msk.f32.vlgmr.msra.gmra.mxu1 %vm281_vm10, %v653_v0 }
 0x6d9   :  { %1118 = vmatpush.msrb.mxu3 %v2395_v45  ;;  %1297 = vmatpush.msra.mxu1 %v2466_v13 }
 0x6db   :  { %1119 = vmatpush.msrb.mxu3 %v2401_v47  ;;  %1298 = vmatpush.msra.mxu1 %v2468_v14 }
 0x6dd   :  { %1120 = vmatpush.msrb.mxu3 %v2405_v49  ;;  %1299 = vmatpush.msra.mxu1 %v2473_v15 }
 0x6df   :  { %1121 = vmatpush.msrb.mxu3 %v2412_v51  ;;  %1300 = vmatpush.msra.mxu1 %v2476_v16 }
 0x723   :  { %v705_v5 = vpop.f32.mrf.mxu0 }
 0x755   :  { %v725_v6 = vpop.f32.mrf.mxu1 }
 0x756   :  { %v726_v10 = vadd.f32 %v725_v6, %v705_v5 }
 0x758   :  { %v728_v11 = vadd.f32 %v2441_v1, %v726_v10 }
 0x75a   :  { %1924 = vtanh.f32 %v728_v11  ;;  %v1811_v27 = vmul.f32 -1.442695, %v728_v11 }
 0x75b   :  { %v673_v12 = vpop.f32.mrf.mxu3 }
 0x75c   :  { %v677_v17 = vrot.slane %v673_v12, 5  ;;  %v678_v18 = vrot.slane %v673_v12, 6 }
 0x75e   :  { %v681_v19 = vadd.f32 %v677_v17, %v2380_v8  ;;  %v682_v20 = vadd.f32 %v678_v18, %v2377_v7 }
 0x760   :  { %v1925_v21 = vpop.eup %1924  ;;  %1926 = vtanh.f32 %v681_v19  ;;  %v1812_v24 = vmul.f32 -1.442695, %v681_v19  ;;  %v1813_v29 = vmul.f32 -1.442695, %v682_v20 }
 0x761   :  { %1928 = vtanh.f32 %v682_v20  ;;  %751 = vrot.lane.b32.xlu1 %v1925_v21, %s2269_s27 }
 0x762   :  { %1930 = vpow2.f32 %v1812_v24 }
 0x766   :  { %v1927_v22 = vpop.eup %1926 }
 0x767   :  { %v1929_v23 = vpop.eup %1928  ;;  %816 = vrot.lane.b32.xlu2 %v1927_v22, %s2269_s27 }
 0x768   :  { %818 = vrot.lane.b32.xlu0 %v1929_v23, %s2269_s27  ;;  %v1931_v25 = vpop.eup %1930  ;;  %v808_v23 = vrot.slane %v2524_v38, 7 }
 0x769   :  { %v772_v26 = vadd.f32 1.0, %v1931_v25 }
 0x76b   :  { %1932 = vrcp.f32 %v772_v26  ;;  %v785_v39 = vand.u32 2147483648, %v772_v26  ;;  %vm779_vm6 = vweird.f32 %v772_v26  ;;  %v783_v40 = vand.u32 2147483647, %v772_v26 }
 0x76c   :  { %1934 = vpow2.f32 %v1811_v27 }
 0x76d   :  { %1936 = vpow2.f32 %v1813_v29  ;;  %v786_v52 = vor.u32 1.1754944e-38, %v785_v39  ;;  %vm784_vm8 = vcmp.eq.f32.partialorder %v783_v40, 8.507059e+37 }
 0x771   :  { %v1933_v28 = vpop.eup %1932 }
 0x772   :  { %v775_v30 = vmul.f32 %v1933_v28, %v772_v26  ;;  %v1935_v31 = vpop.eup %1934  ;;  %vm780_vm5 = vweird.f32 %v1933_v28 }
 0x773   :  { %v732_v33 = vadd.f32 1.0, %v1935_v31  ;;  %v1937_v35 = vpop.eup %1936  ;;  %vm781_vm7 = vmor %vm779_vm6, %vm780_vm5  ;;  %v809_v31 = vrot.slane %v2533_v55, 7 }
 0x774   :  { %v776_v32 = vsub.f32 1.0, %v775_v30  ;;  %v773_v36 = vadd.f32 1.0, %v1937_v35 }
 0x775   :  { %1938 = vrcp.f32 %v732_v33  ;;  %v744_v63 = vand.u32 2147483648, %v732_v33  ;;  %vm738_vm12 = vweird.f32 %v732_v33  ;;  %v742_v9 = vand.u32 2147483647, %v732_v33 }
 0x776   :  { %v777_v34 = vmul.f32 %v1933_v28, %v776_v32  ;;  %1940 = vrcp.f32 %v773_v36  ;;  %v800_v12 = vand.u32 2147483648, %v773_v36  ;;  %vm794_vm0 = vweird.f32 %v773_v36 }
 0x777   :  { %v745_v0 = vor.u32 1.1754944e-38, %v744_v63  ;;  %vm743_vm14 = vcmp.eq.f32.partialorder %v742_v9, 8.507059e+37  ;;  %v798_v17 = vand.u32 2147483647, %v773_v36 }
 0x778   :  { %v778_v37 = vadd.f32 %v1933_v28, %v777_v34  ;;  %v801_v19 = vor.u32 1.1754944e-38, %v800_v12 }
 0x779   :  { %vm799_vm2 = vcmp.eq.f32.partialorder %v798_v17, 8.507059e+37 }
 0x77a   :  { %v782_v42 = vsel %vm781_vm7, %v1933_v28, %v778_v37 }
 0x77b   :  { %v1939_v41 = vpop.eup %1938  ;;  %v787_v53 = vsel %vm784_vm8, %v786_v52, %v782_v42 }
 0x77c   :  { %v734_v3 = vmul.f32 %v1939_v41, %v732_v33  ;;  %v1941_v58 = vpop.eup %1940  ;;  %vm739_vm11 = vweird.f32 %v1939_v41  ;;  %v812_v24 = vmul.f32 %v808_v23, %v787_v53 }
 0x77d   :  { %v790_v56 = vmul.f32 %v1941_v58, %v773_v36  ;;  %vm740_vm13 = vmor %vm738_vm12, %vm739_vm11  ;;  %vm795_vm15 = vweird.f32 %v1941_v58 }
 0x77e   :  { %v735_v59 = vsub.f32 1.0, %v734_v3  ;;  %vm796_vm1 = vmor %vm794_vm0, %vm795_vm15 }
 0x77f   :  { %v791_v61 = vsub.f32 1.0, %v790_v56 }
 0x780   :  { %v736_v60 = vmul.f32 %v1939_v41, %v735_v59 }
 0x781   :  { %v792_v2 = vmul.f32 %v1941_v58, %v791_v61 }
 0x782   :  { %v737_v62 = vadd.f32 %v1939_v41, %v736_v60 }
 0x783   :  { %v793_v10 = vadd.f32 %v1941_v58, %v792_v2 }
 0x784   :  { %v741_v4 = vsel %vm740_vm13, %v1939_v41, %v737_v62 }
 0x785   :  { %v746_v6 = vsel %vm743_vm14, %v745_v0, %v741_v4  ;;  %v797_v18 = vsel %vm796_vm1, %v1941_v58, %v793_v10 }
 0x786   :  { %v802_v21 = vsel %vm799_vm2, %v801_v19, %v797_v18  ;;  %v749_v28 = vmul.f32 %v746_v6, %v2528_v43 }
 0x787   :  { %v813_v32 = vmul.f32 %v809_v31, %v802_v21 }
 0x7c1   :  { %v817_v54 = vpop.permute.xlu2 %816 }
 0x7c2   :  { %v822_v57 = vmul.f32 %v817_v54, %v787_v53 }
 0x7c4   :  { %826 = vrot.lane.b32.xlu2 %v822_v57, %s2271_s10 }
 0x7d3   :  { %v752_v5 = vpop.permute.xlu1 %751 }
 0x7d4   :  { %v754_v11 = vmul.f32 %v752_v5, %v746_v6 }
 0x7d6   :  { %756 = vrot.lane.b32.xlu1 %v754_v11, %s2271_s10 }
 0x7da   :  { %v819_v20 = vpop.permute.xlu0 %818 }
 0x7db   :  { %v823_v22 = vmul.f32 %v819_v20, %v802_v21 }
 0x7dd   :  { %828 = vrot.lane.b32.xlu0 %v823_v22, %s2271_s10 }
 0x81e   :  { %v827_v25 = vpop.permute.xlu2 %826 }
 0x81f   :  { %v2566_v26 = vadd.f32 %v827_v25, %v812_v24 }
 0x821   :  { %1942 = vtanh.f32 %v2566_v26 }
 0x827   :  { %v1943_v27 = vpop.eup %1942 }
 0x828   :  { %838 = vrot.lane.b32.xlu2 %v1943_v27, %s2269_s27 }
 0x848   :  { %v757_v29 = vpop.permute.xlu1 %756 }
 0x849   :  { %v2571_v30 = vadd.f32 %v757_v29, %v749_v28 }
 0x84b   :  { %1944 = vtanh.f32 %v2571_v30 }
 0x84f   :  { %v829_v38 = vpop.permute.xlu0 %828 }
 0x850   :  { %v2575_v33 = vadd.f32 %v829_v38, %v813_v32 }
 0x851   :  { %v1945_v34 = vpop.eup %1944 }
 0x852   :  { %1946 = vtanh.f32 %v2575_v33  ;;  %762 = vrot.lane.b32.xlu1 %v1945_v34, %s2269_s27 }
 0x858   :  { %v1947_v35 = vpop.eup %1946 }
 0x859   :  { %840 = vrot.lane.b32.xlu0 %v1947_v35, %s2269_s27 }
 0x882   :  { %v839_v37 = vpop.permute.xlu2 %838 }
 0x883   :  { %v844_v39 = vmul.f32 %v839_v37, %v787_v53 }
 0x885   :  { %v848_v41 = vrot.slane %v844_v39, 3 }
 0x8c4   :  { %v763_v43 = vpop.permute.xlu1 %762 }
 0x8c5   :  { %v765_v36 = vmul.f32 %v763_v43, %v746_v6 }
 0x8c7   :  { %883 = vrot.lane.b32.xlu0 %v765_v36, %s2271_s10 }
 0x8cb   :  { %v841_v40 = vpop.permute.xlu0 %840 }
 0x8cc   :  { %v845_v55 = vmul.f32 %v841_v40, %v802_v21 }
 0x8ce   :  { %v849_v42 = vrot.slane %v845_v55, 2 }
 0x8d0   :  { %v850_v52 = vsel %vm277_vm9, %v849_v42, %v848_v41 }
 0x8d1   :  { %851 = vrot.lane.b32.xlu2 %v850_v52, %s2271_s10 }
 0x92b   :  { %v852_v3 = vpop.permute.xlu2 %851 }
 0x92c   :  { %1814 = vmatmul.msk.f32.vlgmr.msra.gmra.mxu2 %vm281_vm10, %v852_v3  ;;  %1816 = vmatmul.msk.f32.vlgmr.msra.gmra.mxu0 %vm281_vm10, %v852_v3 }
 0x92d   :  { %1317 = vmatpush.msra.mxu2 %v2395_v45  ;;  %1496 = vmatpush.msra.mxu0 %v2466_v13 }
 0x92f   :  { %1318 = vmatpush.msra.mxu2 %v2401_v47  ;;  %1497 = vmatpush.msra.mxu0 %v2468_v14 }
 0x931   :  { %1319 = vmatpush.msra.mxu2 %v2405_v49  ;;  %1498 = vmatpush.msra.mxu0 %v2473_v15 }
 0x933   :  { %1320 = vmatpush.msra.mxu2 %v2412_v51  ;;  %1499 = vmatpush.msra.mxu0 %v2476_v16 }
 0x939   :  { %v884_v53 = vpop.permute.xlu0 %883 }
 0x93a   :  { %1815 = vmatmul.msk.f32.vlgmr.msra.gmra.mxu3 %vm281_vm10, %v884_v53 }
 0x93b   :  { %1464 = vmatpush.msra.mxu3 %v2393_v44 }
 0x93d   :  { %1465 = vmatpush.msra.mxu3 %v2397_v46 }
 0x93f   :  { %1466 = vmatpush.msra.mxu3 %v2403_v48 }
 0x941   :  { %1467 = vmatpush.msra.mxu3 %v2410_v50 }
 0x9a9   :  { %v924_v44 = vpop.f32.mrf.mxu0 }
 0x9af   :  { %v872_v45 = vpop.f32.mrf.mxu2 }
 0x9b0   :  { %v876_v47 = vrot.slane %v872_v45, 4  ;;  %v877_v49 = vrot.slane %v872_v45, 5 }
 0x9b2   :  { %v880_v54 = vadd.f32 %v876_v47, %v2380_v8  ;;  %v881_v51 = vadd.f32 %v877_v49, %v2377_v7  ;;  %v1008_v49 = vrot.slane %v2575_v33, 7 }
 0x9b4   :  { %1948 = vtanh.f32 %v880_v54  ;;  %v1819_v56 = vmul.f32 -1.442695, %v881_v51  ;;  %v1818_v63 = vmul.f32 -1.442695, %v880_v54 }
 0x9b5   :  { %1950 = vtanh.f32 %v881_v51 }
 0x9ba   :  { %v1949_v57 = vpop.eup %1948 }
 0x9bb   :  { %v1951_v58 = vpop.eup %1950  ;;  %1015 = vrot.lane.b32.xlu1 %v1949_v57, %s2269_s27 }
 0x9bc   :  { %1017 = vrot.lane.b32.xlu2 %v1951_v58, %s2269_s27 }
 0x9bd   :  { %v904_v46 = vpop.f32.mrf.mxu3 }
 0x9be   :  { %v925_v48 = vadd.f32 %v924_v44, %v904_v46  ;;  %v1007_v44 = vrot.slane %v2566_v26, 7 }
 0x9c0   :  { %v927_v50 = vadd.f32 %v2441_v1, %v925_v48 }
 0x9c2   :  { %1952 = vtanh.f32 %v927_v50  ;;  %v1817_v6 = vmul.f32 -1.442695, %v927_v50 }
 0x9c3   :  { %1954 = vpow2.f32 %v1819_v56 }
 0x9c8   :  { %v1953_v59 = vpop.eup %1952 }
 0x9c9   :  { %950 = vrot.lane.b32.xlu0 %v1953_v59, %s2269_s27  ;;  %v1955_v60 = vpop.eup %1954 }
 0x9ca   :  { %v972_v61 = vadd.f32 1.0, %v1955_v60 }
 0x9cc   :  { %1956 = vrcp.f32 %v972_v61  ;;  %v999_v1 = vand.u32 2147483648, %v972_v61  ;;  %vm993_vm4 = vweird.f32 %v972_v61  ;;  %v997_v11 = vand.u32 2147483647, %v972_v61 }
 0x9cd   :  { %1958 = vpow2.f32 %v1818_v63 }
 0x9ce   :  { %v1000_v17 = vor.u32 1.1754944e-38, %v999_v1  ;;  %vm998_vm6 = vcmp.eq.f32.partialorder %v997_v11, 8.507059e+37  ;;  %v2052_v1 = vld [vmem:[#allocation8 + $0x18] sm:$0xff]  ;;  %v2053_v11 = vld [vmem:[#allocation8 + $0x10] sm:$0xff] }
 0x9d2   :  { %v1957_v62 = vpop.eup %1956 }
 0x9d3   :  { %v989_v9 = vmul.f32 %v1957_v62, %v972_v61  ;;  %v1959_v4 = vpop.eup %1958  ;;  %vm994_vm3 = vweird.f32 %v1957_v62 }
 0x9d4   :  { %v971_v5 = vadd.f32 1.0, %v1959_v4  ;;  %vm995_vm5 = vmor %vm993_vm4, %vm994_vm3 }
 0x9d5   :  { %v990_v2 = vsub.f32 1.0, %v989_v9 }
 0x9d6   :  { %1960 = vrcp.f32 %v971_v5  ;;  %v984_v31 = vand.u32 2147483648, %v971_v5  ;;  %vm978_vm8 = vweird.f32 %v971_v5  ;;  %v982_v32 = vand.u32 2147483647, %v971_v5 }
 0x9d7   :  { %v991_v0 = vmul.f32 %v1957_v62, %v990_v2  ;;  %1962 = vpow2.f32 %v1817_v6 }
 0x9d8   :  { %v985_v35 = vor.u32 1.1754944e-38, %v984_v31  ;;  %vm983_vm12 = vcmp.eq.f32.partialorder %v982_v32, 8.507059e+37 }
 0x9d9   :  { %v992_v10 = vadd.f32 %v1957_v62, %v991_v0 }
 0x9db   :  { %v996_v12 = vsel %vm995_vm5, %v1957_v62, %v992_v10 }
 0x9dc   :  { %v1001_v19 = vsel %vm998_vm6, %v1000_v17, %v996_v12  ;;  %v1961_v20 = vpop.eup %1960  ;;  %v2054_v12 = vld [vmem:[#allocation8 + $0x8] sm:$0xff] }
 0x9dd   :  { %v1963_v22 = vpop.eup %1962  ;;  %v974_v23 = vmul.f32 %v1961_v20, %v971_v5  ;;  %vm979_vm7 = vweird.f32 %v1961_v20  ;;  %v1012_v54 = vmul.f32 %v1008_v49, %v1001_v19 }
 0x9de   :  { %v931_v24 = vadd.f32 1.0, %v1963_v22  ;;  %vm980_vm11 = vmor %vm978_vm8, %vm979_vm7  ;;  %v2634_v22 = vld [vmem:[#allocation11] ss:$0 sm:$0xff] }
 0x9df   :  { %v975_v25 = vsub.f32 1.0, %v974_v23 }
 0x9e0   :  { %1964 = vrcp.f32 %v931_v24  ;;  %v943_v41 = vand.u32 2147483648, %v931_v24  ;;  %vm937_vm14 = vweird.f32 %v931_v24  ;;  %v941_v42 = vand.u32 2147483647, %v931_v24 }
 0x9e1   :  { %v976_v27 = vmul.f32 %v1961_v20, %v975_v25 }
 0x9e2   :  { %v944_v3 = vor.u32 1.1754944e-38, %v943_v41  ;;  %vm942_vm0 = vcmp.eq.f32.partialorder %v941_v42, 8.507059e+37 }
 0x9e3   :  { %v977_v29 = vadd.f32 %v1961_v20, %v976_v27 }
 0x9e5   :  { %v981_v34 = vsel %vm980_vm11, %v1961_v20, %v977_v29 }
 0x9e6   :  { %v1965_v28 = vpop.eup %1964  ;;  %v986_v37 = vsel %vm983_vm12, %v985_v35, %v981_v34 }
 0x9e7   :  { %v933_v38 = vmul.f32 %v1965_v28, %v931_v24  ;;  %vm938_vm13 = vweird.f32 %v1965_v28  ;;  %v1011_v46 = vmul.f32 %v1007_v44, %v986_v37 }
 0x9e8   :  { %vm939_vm15 = vmor %vm937_vm14, %vm938_vm13 }
 0x9e9   :  { %v934_v43 = vsub.f32 1.0, %v933_v38 }
 0x9eb   :  { %v935_v40 = vmul.f32 %v1965_v28, %v934_v43 }
 0x9ed   :  { %v936_v55 = vadd.f32 %v1965_v28, %v935_v40 }
 0x9ef   :  { %v940_v52 = vsel %vm939_vm15, %v1965_v28, %v936_v55 }
 0x9f0   :  { %v945_v45 = vsel %vm942_vm0, %v944_v3, %v940_v52 }
 0x9f1   :  { %v948_v33 = vmul.f32 %v945_v45, %v2571_v30 }
 0xa16   :  { %v1018_v18 = vpop.permute.xlu2 %1017 }
 0xa17   :  { %v1022_v21 = vmul.f32 %v1018_v18, %v1001_v19 }
 0xa19   :  { %1027 = vrot.lane.b32.xlu2 %v1022_v21, %s2271_s10 }
 0xa2d   :  { %v1016_v36 = vpop.permute.xlu1 %1015 }
 0xa2e   :  { %v1021_v39 = vmul.f32 %v1016_v36, %v986_v37 }
 0xa30   :  { %1025 = vrot.lane.b32.xlu1 %v1021_v39, %s2271_s10 }
 0xa3b   :  { %v951_v53 = vpop.permute.xlu0 %950 }
 0xa3c   :  { %v953_v47 = vmul.f32 %v951_v53, %v945_v45 }
 0xa3e   :  { %955 = vrot.lane.b32.xlu0 %v953_v47, %s2271_s10 }
 0xa73   :  { %v1028_v51 = vpop.permute.xlu2 %1027 }
 0xa74   :  { %v2608_v57 = vadd.f32 %v1028_v51, %v1012_v54 }
 0xa76   :  { %1966 = vtanh.f32 %v2608_v57 }
 0xa7c   :  { %v1967_v58 = vpop.eup %1966 }
 0xa7d   :  { %1039 = vrot.lane.b32.xlu2 %v1967_v58, %s2269_s27 }
 0xaa2   :  { %v1026_v48 = vpop.permute.xlu1 %1025 }
 0xaa3   :  { %v2613_v50 = vadd.f32 %v1026_v48, %v1011_v46 }
 0xaa5   :  { %1968 = vtanh.f32 %v2613_v50 }
 0xaab   :  { %v1969_v59 = vpop.eup %1968 }
 0xaac   :  { %1037 = vrot.lane.b32.xlu1 %v1969_v59, %s2269_s27 }
 0xab0   :  { %v956_v56 = vpop.permute.xlu0 %955 }
 0xab1   :  { %v2618_v60 = vadd.f32 %v956_v56, %v948_v33 }
 0xab3   :  { %1970 = vtanh.f32 %v2618_v60 }
 0xab9   :  { %v1971_v61 = vpop.eup %1970 }
 0xaba   :  { %961 = vrot.lane.b32.xlu0 %v1971_v61, %s2269_s27 }
 0xad7   :  { %v1040_v26 = vpop.permute.xlu2 %1039 }
 0xad8   :  { %v1044_v62 = vmul.f32 %v1040_v26, %v1001_v19 }
 0xada   :  { %v1048_v2 = vrot.slane %v1044_v62, 3 }
 0xb1e   :  { %v1038_v63 = vpop.permute.xlu1 %1037 }
 0xb1f   :  { %v1043_v9 = vmul.f32 %v1038_v63, %v986_v37 }
 0xb21   :  { %v1047_v4 = vrot.slane %v1043_v9, 4 }
 0xb23   :  { %v1049_v0 = vsel %vm277_vm9, %v1048_v2, %v1047_v4 }
 0xb24   :  { %1050 = vrot.lane.b32.xlu1 %v1049_v0, %s2271_s10 }
 0xb2c   :  { %v962_v5 = vpop.permute.xlu0 %961 }
 0xb2d   :  { %v964_v30 = vmul.f32 %v962_v5, %v945_v45 }
 0xb2f   :  { %1082 = vrot.lane.b32.xlu2 %v964_v30, %s2271_s10 }
 0xb89   :  { %v1083_v6 = vpop.permute.xlu2 %1082 }
 0xb8a   :  { %1821 = vmatmul.msk.f32.vlgmr.msrb.gmra.mxu2 %vm281_vm10, %v1083_v6 }
 0xb8b   :  { %1659 = vmatpush.msrb.mxu2 %v2466_v13  ;;  %v2055_v13 = vld [vmem:[#allocation8] sm:$0xff] }
 0xb8d   :  { %1660 = vmatpush.msrb.mxu2 %v2468_v14 }
 0xb8f   :  { %1661 = vmatpush.msrb.mxu2 %v2473_v15 }
 0xb91   :  { %1662 = vmatpush.msrb.mxu2 %v2476_v16 }
 0xb96   :  { %v1051_v10 = vpop.permute.xlu1 %1050 }
 0xb97   :  { %1820 = vmatmul.msk.f32.vlgmr.msrb.gmra.mxu1 %vm281_vm10, %v1051_v10  ;;  %1822 = vmatmul.msk.f32.vlgmr.msrb.gmra.mxu3 %vm281_vm10, %v1051_v10 }
 0xb98   :  { %1516 = vmatpush.msrb.mxu1 %v2052_v1  ;;  %1688 = vmatpush.msrb.mxu3 %v2052_v1 }
 0xb9a   :  { %1517 = vmatpush.msrb.mxu1 %v2053_v11  ;;  %1689 = vmatpush.msrb.mxu3 %v2053_v11 }
 0xb9c   :  { %1518 = vmatpush.msrb.mxu1 %v2054_v12  ;;  %1690 = vmatpush.msrb.mxu3 %v2054_v12 }
 0xb9e   :  { %1519 = vmatpush.msrb.mxu1 %v2055_v13  ;;  %1691 = vmatpush.msrb.mxu3 %v2055_v13 }
 0xc0d   :  { %v1103_v19 = vpop.f32.mrf.mxu2 }
 0xc14   :  { %v1071_v14 = vpop.f32.mrf.mxu1 }
 0xc15   :  { %v1075_v15 = vrot.slane %v1071_v14, 3  ;;  %v1076_v16 = vrot.slane %v1071_v14, 4 }
 0xc17   :  { %v1079_v17 = vadd.f32 %v1075_v15, %v2380_v8  ;;  %v1080_v18 = vadd.f32 %v1076_v16, %v2377_v7 }
 0xc19   :  { %1972 = vtanh.f32 %v1079_v17  ;;  %v1824_v32 = vmul.f32 -1.442695, %v1079_v17  ;;  %v1825_v38 = vmul.f32 -1.442695, %v1080_v18  ;;  %v1206_v17 = vrot.slane %v2613_v50, 7 }
 0xc1a   :  { %1974 = vtanh.f32 %v1080_v18  ;;  %v1123_v20 = vpop.f32.mrf.mxu3  ;;  %v1207_v18 = vrot.slane %v2608_v57, 7 }
 0xc1b   :  { %v1124_v21 = vadd.f32 %v1123_v20, %v1103_v19 }
 0xc1d   :  { %v1126_v23 = vadd.f32 %v2634_v22, %v1124_v21 }
 0xc1f   :  { %v1973_v24 = vpop.eup %1972  ;;  %1976 = vtanh.f32 %v1126_v23  ;;  %v1823_v28 = vmul.f32 -1.442695, %v1126_v23 }
 0xc20   :  { %v1975_v25 = vpop.eup %1974  ;;  %1214 = vrot.lane.b32.xlu0 %v1973_v24, %s2269_s27 }
 0xc21   :  { %1216 = vrot.lane.b32.xlu1 %v1975_v25, %s2269_s27  ;;  %1978 = vpow2.f32 %v1823_v28 }
 0xc25   :  { %v1977_v27 = vpop.eup %1976 }
 0xc26   :  { %1149 = vrot.lane.b32.xlu2 %v1977_v27, %s2269_s27 }
 0xc27   :  { %v1979_v29 = vpop.eup %1978 }
 0xc28   :  { %v1130_v31 = vadd.f32 1.0, %v1979_v29 }
 0xc2a   :  { %1980 = vrcp.f32 %v1130_v31  ;;  %v1142_v42 = vand.u32 2147483648, %v1130_v31  ;;  %vm1136_vm2 = vweird.f32 %v1130_v31  ;;  %v1140_v52 = vand.u32 2147483647, %v1130_v31 }
 0xc2b   :  { %1982 = vpow2.f32 %v1824_v32 }
 0xc2c   :  { %1984 = vpow2.f32 %v1825_v38  ;;  %v1143_v47 = vor.u32 1.1754944e-38, %v1142_v42  ;;  %vm1141_vm4 = vcmp.eq.f32.partialorder %v1140_v52, 8.507059e+37 }
 0xc30   :  { %v1981_v34 = vpop.eup %1980 }
 0xc31   :  { %v1132_v35 = vmul.f32 %v1981_v34, %v1130_v31  ;;  %v1983_v43 = vpop.eup %1982  ;;  %vm1137_vm1 = vweird.f32 %v1981_v34 }
 0xc32   :  { %v1985_v36 = vpop.eup %1984  ;;  %v1170_v39 = vadd.f32 1.0, %v1983_v43  ;;  %vm1138_vm3 = vmor %vm1136_vm2, %vm1137_vm1 }
 0xc33   :  { %v1133_v37 = vsub.f32 1.0, %v1132_v35  ;;  %v1171_v40 = vadd.f32 1.0, %v1985_v36 }
 0xc34   :  { %1986 = vrcp.f32 %v1170_v39  ;;  %v1183_v26 = vand.u32 2147483648, %v1170_v39  ;;  %vm1177_vm7 = vweird.f32 %v1170_v39  ;;  %v1181_v63 = vand.u32 2147483647, %v1170_v39 }
 0xc35   :  { %v1134_v55 = vmul.f32 %v1981_v34, %v1133_v37  ;;  %1988 = vrcp.f32 %v1171_v40  ;;  %v1198_v62 = vand.u32 2147483648, %v1171_v40  ;;  %vm1192_vm8 = vweird.f32 %v1171_v40 }
 0xc36   :  { %v1196_v9 = vand.u32 2147483647, %v1171_v40  ;;  %v1184_v0 = vor.u32 1.1754944e-38, %v1183_v26  ;;  %vm1182_vm13 = vcmp.eq.f32.partialorder %v1181_v63, 8.507059e+37 }
 0xc37   :  { %v1135_v41 = vadd.f32 %v1981_v34, %v1134_v55  ;;  %v1199_v5 = vor.u32 1.1754944e-38, %v1198_v62 }
 0xc38   :  { %vm1197_vm14 = vcmp.eq.f32.partialorder %v1196_v9, 8.507059e+37 }
 0xc39   :  { %v1139_v45 = vsel %vm1138_vm3, %v1981_v34, %v1135_v41 }
 0xc3a   :  { %v1987_v3 = vpop.eup %1986  ;;  %v1144_v51 = vsel %vm1141_vm4, %v1143_v47, %v1139_v45 }
 0xc3b   :  { %v1989_v53 = vpop.eup %1988  ;;  %v1173_v49 = vmul.f32 %v1987_v3, %v1170_v39  ;;  %vm1178_vm5 = vweird.f32 %v1987_v3  ;;  %v1147_v13 = vmul.f32 %v1144_v51, %v2618_v60 }
 0xc3c   :  { %v1188_v58 = vmul.f32 %v1989_v53, %v1171_v40  ;;  %vm1193_vm6 = vweird.f32 %v1989_v53  ;;  %vm1179_vm11 = vmor %vm1177_vm7, %vm1178_vm5 }
 0xc3d   :  { %v1174_v46 = vsub.f32 1.0, %v1173_v49  ;;  %vm1194_vm12 = vmor %vm1192_vm8, %vm1193_vm6 }
 0xc3e   :  { %v1189_v48 = vsub.f32 1.0, %v1188_v58 }
 0xc3f   :  { %v1175_v59 = vmul.f32 %v1987_v3, %v1174_v46 }
 0xc40   :  { %v1190_v33 = vmul.f32 %v1989_v53, %v1189_v48 }
 0xc41   :  { %v1176_v56 = vadd.f32 %v1987_v3, %v1175_v59 }
 0xc42   :  { %v1191_v61 = vadd.f32 %v1989_v53, %v1190_v33 }
 0xc43   :  { %v1180_v2 = vsel %vm1179_vm11, %v1987_v3, %v1176_v56 }
 0xc44   :  { %v1195_v4 = vsel %vm1194_vm12, %v1989_v53, %v1191_v61  ;;  %v1185_v6 = vsel %vm1182_vm13, %v1184_v0, %v1180_v2 }
 0xc45   :  { %v1200_v1 = vsel %vm1197_vm14, %v1199_v5, %v1195_v4  ;;  %v1210_v19 = vmul.f32 %v1206_v17, %v1185_v6 }
 0xc46   :  { %v1211_v20 = vmul.f32 %v1207_v18, %v1200_v1 }
 0xc80   :  { %v1150_v54 = vpop.permute.xlu2 %1149 }
 0xc81   :  { %v1152_v44 = vmul.f32 %v1150_v54, %v1144_v51 }
 0xc83   :  { %1154 = vrot.lane.b32.xlu2 %v1152_v44, %s2271_s10 }
 0xc92   :  { %v1215_v30 = vpop.permute.xlu0 %1214 }
 0xc93   :  { %v1217_v10 = vpop.permute.xlu1 %1216  ;;  %v1220_v11 = vmul.f32 %v1215_v30, %v1185_v6 }
 0xc94   :  { %v1221_v12 = vmul.f32 %v1217_v10, %v1200_v1 }
 0xc95   :  { %1224 = vrot.lane.b32.xlu0 %v1220_v11, %s2271_s10 }
 0xc96   :  { %1226 = vrot.lane.b32.xlu1 %v1221_v12, %s2271_s10 }
 0xcdd   :  { %v1155_v14 = vpop.permute.xlu2 %1154 }
 0xcde   :  { %v2644_v15 = vadd.f32 %v1155_v14, %v1147_v13 }
 0xce0   :  { %1990 = vtanh.f32 %v2644_v15 }
 0xce6   :  { %v1991_v16 = vpop.eup %1990 }
 0xce7   :  { %1160 = vrot.lane.b32.xlu2 %v1991_v16, %s2269_s27 }
 0xd07   :  { %v1225_v21 = vpop.permute.xlu0 %1224 }
 0xd08   :  { %v1227_v23 = vpop.permute.xlu1 %1226  ;;  %v2650_v24 = vadd.f32 %v1225_v21, %v1210_v19 }
 0xd09   :  { %v2652_v25 = vadd.f32 %v1227_v23, %v1211_v20 }
 0xd0a   :  { %1992 = vtanh.f32 %v2650_v24 }
 0xd0b   :  { %1994 = vtanh.f32 %v2652_v25 }
 0xd10   :  { %v1993_v60 = vpop.eup %1992 }
 0xd11   :  { %v1995_v27 = vpop.eup %1994  ;;  %1236 = vrot.lane.b32.xlu0 %v1993_v60, %s2269_s27 }
 0xd12   :  { %1238 = vrot.lane.b32.xlu1 %v1995_v27, %s2269_s27 }
 0xd41   :  { %v1161_v50 = vpop.permute.xlu2 %1160 }
 0xd42   :  { %v1163_v57 = vmul.f32 %v1161_v50, %v1144_v51 }
 0xd44   :  { %1281 = vrot.lane.b32.xlu1 %v1163_v57, %s2271_s10 }
 0xd83   :  { %v1237_v28 = vpop.permute.xlu0 %1236 }
 0xd84   :  { %v1239_v29 = vpop.permute.xlu1 %1238  ;;  %v1242_v31 = vmul.f32 %v1237_v28, %v1185_v6 }
 0xd85   :  { %v1243_v32 = vmul.f32 %v1239_v29, %v1200_v1 }
 0xd86   :  { %v1246_v38 = vrot.slane %v1242_v31, 5 }
 0xd87   :  { %v1247_v34 = vrot.slane %v1243_v32, 4 }
 0xd89   :  { %v1248_v35 = vsel %vm277_vm9, %v1247_v34, %v1246_v38 }
 0xd8a   :  { %1249 = vrot.lane.b32.xlu0 %v1248_v35, %s2271_s10 }
 0xdb6   :  { %v1282_v43 = vpop.permute.xlu1 %1281 }
 0xdb7   :  { %1827 = vmatmul.msk.f32.vlgmr.msra.gmra.mxu1 %vm281_vm10, %v1282_v43 }
 0xdfc   :  { %v1250_v36 = vpop.permute.xlu0 %1249 }
 0xdfd   :  { %1826 = vmatmul.msk.f32.vlgmr.msrb.gmra.mxu0 %vm281_vm10, %v1250_v36  ;;  %1828 = vmatmul.msk.f32.vlgmr.msra.gmra.mxu2 %vm281_vm10, %v1250_v36  ;;  %v1405_v36 = vrot.slane %v2650_v24, 7 }
 0xe34   :  { %v1302_v42 = vpop.f32.mrf.mxu1 }
 0xe7a   :  { %v1270_v37 = vpop.f32.mrf.mxu0 }
 0xe7b   :  { %v1274_v39 = vrot.slane %v1270_v37, 2  ;;  %v1275_v40 = vrot.slane %v1270_v37, 3 }
 0xe7d   :  { %v1278_v55 = vadd.f32 %v1274_v39, %v2380_v8  ;;  %v1279_v41 = vadd.f32 %v1275_v40, %v2377_v7 }
 0xe7f   :  { %1996 = vtanh.f32 %v1278_v55  ;;  %v1830_v54 = vmul.f32 -1.442695, %v1278_v55  ;;  %v1831_v46 = vmul.f32 -1.442695, %v1279_v41 }
 0xe80   :  { %1998 = vtanh.f32 %v1279_v41  ;;  %v1322_v52 = vpop.f32.mrf.mxu2  ;;  %v1406_v41 = vrot.slane %v2652_v25, 7 }
 0xe81   :  { %v1323_v3 = vadd.f32 %v1322_v52, %v1302_v42 }
 0xe83   :  { %v1325_v53 = vadd.f32 %v2634_v22, %v1323_v3 }
 0xe85   :  { %v1997_v45 = vpop.eup %1996  ;;  %2000 = vtanh.f32 %v1325_v53  ;;  %v1829_v59 = vmul.f32 -1.442695, %v1325_v53 }
 0xe86   :  { %v1999_v47 = vpop.eup %1998  ;;  %1413 = vrot.lane.b32.xlu2 %v1997_v45, %s2269_s27  ;;  %2002 = vpow2.f32 %v1830_v54 }
 0xe87   :  { %1415 = vrot.lane.b32.xlu0 %v1999_v47, %s2269_s27 }
 0xe8b   :  { %v2001_v49 = vpop.eup %2000 }
 0xe8c   :  { %1348 = vrot.lane.b32.xlu1 %v2001_v49, %s2269_s27  ;;  %v2003_v51 = vpop.eup %2002 }
 0xe8d   :  { %v1369_v58 = vadd.f32 1.0, %v2003_v51 }
 0xe8f   :  { %2004 = vrcp.f32 %v1369_v58  ;;  %v1382_v63 = vand.u32 2147483648, %v1369_v58  ;;  %vm1376_vm0 = vweird.f32 %v1369_v58  ;;  %v1380_v2 = vand.u32 2147483647, %v1369_v58 }
 0xe90   :  { %2006 = vpow2.f32 %v1831_v46 }
 0xe91   :  { %2008 = vpow2.f32 %v1829_v59  ;;  %v1383_v5 = vor.u32 1.1754944e-38, %v1382_v63  ;;  %vm1381_vm2 = vcmp.eq.f32.partialorder %v1380_v2, 8.507059e+37 }
 0xe95   :  { %v2005_v44 = vpop.eup %2004 }
 0xe96   :  { %v1372_v48 = vmul.f32 %v2005_v44, %v1369_v58  ;;  %v2007_v61 = vpop.eup %2006  ;;  %vm1377_vm15 = vweird.f32 %v2005_v44 }
 0xe97   :  { %v1370_v26 = vadd.f32 1.0, %v2007_v61  ;;  %v2009_v9 = vpop.eup %2008  ;;  %vm1378_vm1 = vmor %vm1376_vm0, %vm1377_vm15 }
 0xe98   :  { %v1373_v33 = vsub.f32 1.0, %v1372_v48  ;;  %v1329_v0 = vadd.f32 1.0, %v2009_v9 }
 0xe99   :  { %2010 = vrcp.f32 %v1370_v26  ;;  %v1397_v19 = vand.u32 2147483648, %v1370_v26  ;;  %vm1391_vm4 = vweird.f32 %v1370_v26  ;;  %v1395_v21 = vand.u32 2147483647, %v1370_v26 }
 0xe9a   :  { %v1374_v56 = vmul.f32 %v2005_v44, %v1373_v33  ;;  %2012 = vrcp.f32 %v1329_v0  ;;  %v1341_v50 = vand.u32 2147483648, %v1329_v0  ;;  %vm1335_vm8 = vweird.f32 %v1329_v0 }
 0xe9b   :  { %v1398_v60 = vor.u32 1.1754944e-38, %v1397_v19  ;;  %vm1396_vm7 = vcmp.eq.f32.partialorder %v1395_v21, 8.507059e+37  ;;  %v1339_v29 = vand.u32 2147483647, %v1329_v0 }
 0xe9c   :  { %v1375_v62 = vadd.f32 %v2005_v44, %v1374_v56  ;;  %v1342_v38 = vor.u32 1.1754944e-38, %v1341_v50 }
 0xe9d   :  { %vm1340_vm12 = vcmp.eq.f32.partialorder %v1339_v29, 8.507059e+37 }
 0xe9e   :  { %v1379_v4 = vsel %vm1378_vm1, %v2005_v44, %v1375_v62 }
 0xe9f   :  { %v1384_v6 = vsel %vm1381_vm2, %v1383_v5, %v1379_v4  ;;  %v2011_v1 = vpop.eup %2010 }
 0xea0   :  { %v1387_v11 = vmul.f32 %v2011_v1, %v1370_v26  ;;  %v2013_v12 = vpop.eup %2012  ;;  %vm1392_vm3 = vweird.f32 %v2011_v1  ;;  %v1409_v37 = vmul.f32 %v1405_v36, %v1384_v6 }
 0xea1   :  { %v1331_v14 = vmul.f32 %v2013_v12, %v1329_v0  ;;  %vm1393_vm5 = vmor %vm1391_vm4, %vm1392_vm3  ;;  %vm1336_vm6 = vweird.f32 %v2013_v12 }
 0xea2   :  { %v1388_v13 = vsub.f32 1.0, %v1387_v11  ;;  %vm1337_vm11 = vmor %vm1335_vm8, %vm1336_vm6 }
 0xea3   :  { %v1332_v17 = vsub.f32 1.0, %v1331_v14 }
 0xea4   :  { %v1389_v16 = vmul.f32 %v2011_v1, %v1388_v13 }
 0xea5   :  { %v1333_v20 = vmul.f32 %v2013_v12, %v1332_v17 }
 0xea6   :  { %v1390_v18 = vadd.f32 %v2011_v1, %v1389_v16 }
 0xea7   :  { %v1334_v27 = vadd.f32 %v2013_v12, %v1333_v20 }
 0xea8   :  { %v1394_v23 = vsel %vm1393_vm5, %v2011_v1, %v1390_v18 }
 0xea9   :  { %v1399_v28 = vsel %vm1396_vm7, %v1398_v60, %v1394_v23  ;;  %v1338_v32 = vsel %vm1337_vm11, %v2013_v12, %v1334_v27 }
 0xeaa   :  { %v1343_v35 = vsel %vm1340_vm12, %v1342_v38, %v1338_v32  ;;  %v1410_v42 = vmul.f32 %v1406_v41, %v1399_v28 }
 0xeab   :  { %v1346_v53 = vmul.f32 %v1343_v35, %v2644_v15 }
 0xee0   :  { %v1414_v30 = vpop.permute.xlu2 %1413 }
 0xee1   :  { %v1419_v10 = vmul.f32 %v1414_v30, %v1384_v6 }
 0xee3   :  { %1423 = vrot.lane.b32.xlu2 %v1419_v10, %s2271_s10 }
 0xef9   :  { %v1416_v57 = vpop.permute.xlu0 %1415 }
 0xefa   :  { %v1420_v31 = vmul.f32 %v1416_v57, %v1399_v28 }
 0xefc   :  { %1425 = vrot.lane.b32.xlu0 %v1420_v31, %s2271_s10 }
 0xefe   :  { %v1349_v34 = vpop.permute.xlu1 %1348 }
 0xeff   :  { %v1351_v43 = vmul.f32 %v1349_v34, %v1343_v35 }
 0xf01   :  { %1353 = vrot.lane.b32.xlu1 %v1351_v43, %s2271_s10 }
 0xf3d   :  { %v1424_v39 = vpop.permute.xlu2 %1423 }
 0xf3e   :  { %v2674_v40 = vadd.f32 %v1424_v39, %v1409_v37 }
 0xf40   :  { %2014 = vtanh.f32 %v2674_v40 }
 0xf46   :  { %v2015_v55 = vpop.eup %2014 }
 0xf47   :  { %1435 = vrot.lane.b32.xlu2 %v2015_v55, %s2269_s27 }
 0xf6e   :  { %v1426_v52 = vpop.permute.xlu0 %1425 }
 0xf6f   :  { %v2679_v3 = vadd.f32 %v1426_v52, %v1410_v42 }
 0xf71   :  { %2016 = vtanh.f32 %v2679_v3 }
 0xf73   :  { %v1354_v24 = vpop.permute.xlu1 %1353 }
 0xf74   :  { %v2683_v45 = vadd.f32 %v1354_v24, %v1346_v53 }
 0xf76   :  { %2018 = vtanh.f32 %v2683_v45 }
 0xf77   :  { %v2017_v47 = vpop.eup %2016 }
 0xf78   :  { %1437 = vrot.lane.b32.xlu0 %v2017_v47, %s2269_s27 }
 0xf7c   :  { %v2019_v49 = vpop.eup %2018 }
 0xf7d   :  { %1359 = vrot.lane.b32.xlu1 %v2019_v49, %s2269_s27 }
 0xfa1   :  { %v1436_v25 = vpop.permute.xlu2 %1435 }
 0xfa2   :  { %v1441_v54 = vmul.f32 %v1436_v25, %v1384_v6 }
 0xfa4   :  { %v1445_v44 = vrot.slane %v1441_v54, 6 }
 0xfea   :  { %v1438_v51 = vpop.permute.xlu0 %1437 }
 0xfeb   :  { %v1442_v58 = vmul.f32 %v1438_v51, %v1399_v28 }
 0xfed   :  { %v1446_v46 = vrot.slane %v1442_v58, 5 }
 0xfef   :  { %v1360_v48 = vpop.permute.xlu1 %1359  ;;  %v1447_v15 = vsel %vm277_vm9, %v1446_v46, %v1445_v44 }
 0xff0   :  { %v1362_v59 = vmul.f32 %v1360_v48, %v1343_v35  ;;  %1448 = vrot.lane.b32.xlu2 %v1447_v15, %s2271_s10 }
 0xff2   :  { %1480 = vrot.lane.b32.xlu0 %v1362_v59, %s2271_s10  ;;  %v1605_v59 = vrot.slane %v2679_v3, 7 }
0x104a   :  { %v1449_v33 = vpop.permute.xlu2 %1448 }
0x104b   :  { %1832 = vmatmul.msk.f32.vlgmr.msra.gmra.mxu3 %vm281_vm10, %v1449_v33  ;;  %1834 = vmatmul.msk.f32.vlgmr.msrb.gmra.mxu1 %vm281_vm10, %v1449_v33 }
0x1064   :  { %v1481_v56 = vpop.permute.xlu0 %1480 }
0x1065   :  { %1833 = vmatmul.msk.f32.vlgmr.msra.gmra.mxu0 %vm281_vm10, %v1481_v56 }
0x10c8   :  { %v1521_v0 = vpop.f32.mrf.mxu1 }
0x10ce   :  { %v1469_v61 = vpop.f32.mrf.mxu3 }
0x10cf   :  { %v1473_v26 = vrot.slane %v1469_v61, 1  ;;  %v1474_v62 = vrot.slane %v1469_v61, 2 }
0x10d1   :  { %v1477_v63 = vadd.f32 %v1473_v26, %v2380_v8  ;;  %v1478_v9 = vadd.f32 %v1474_v62, %v2377_v7  ;;  %v1604_v62 = vrot.slane %v2674_v40, 7 }
0x10d3   :  { %2020 = vtanh.f32 %v1477_v63  ;;  %v1837_v8 = vmul.f32 -1.442695, %v1478_v9  ;;  %v1836_v12 = vmul.f32 -1.442695, %v1477_v63 }
0x10d4   :  { %2022 = vtanh.f32 %v1478_v9 }
0x10d9   :  { %v2021_v2 = vpop.eup %2020 }
0x10da   :  { %v2023_v4 = vpop.eup %2022  ;;  %1612 = vrot.lane.b32.xlu1 %v2021_v2, %s2269_s27 }
0x10db   :  { %1614 = vrot.lane.b32.xlu2 %v2023_v4, %s2269_s27 }
0x10e2   :  { %v1501_v5 = vpop.f32.mrf.mxu0 }
0x10e3   :  { %v1522_v30 = vadd.f32 %v1521_v0, %v1501_v5 }
0x10e5   :  { %v1524_v6 = vadd.f32 %v2634_v22, %v1522_v30 }
0x10e7   :  { %2024 = vtanh.f32 %v1524_v6  ;;  %v1835_v60 = vmul.f32 -1.442695, %v1524_v6 }
0x10e8   :  { %2026 = vpow2.f32 %v1837_v8 }
0x10ed   :  { %v2025_v10 = vpop.eup %2024 }
0x10ee   :  { %1547 = vrot.lane.b32.xlu0 %v2025_v10, %s2269_s27  ;;  %v2027_v7 = vpop.eup %2026 }
0x10ef   :  { %v1569_v1 = vadd.f32 1.0, %v2027_v7 }
0x10f1   :  { %2028 = vrcp.f32 %v1569_v1  ;;  %v1596_v20 = vand.u32 2147483648, %v1569_v1  ;;  %vm1590_vm14 = vweird.f32 %v1569_v1  ;;  %v1594_v21 = vand.u32 2147483647, %v1569_v1 }
0x10f2   :  { %2030 = vpow2.f32 %v1836_v12 }
0x10f3   :  { %v1597_v27 = vor.u32 1.1754944e-38, %v1596_v20  ;;  %vm1595_vm0 = vcmp.eq.f32.partialorder %v1594_v21, 8.507059e+37 }
0x10f7   :  { %v2029_v11 = vpop.eup %2028 }
0x10f8   :  { %v1586_v13 = vmul.f32 %v2029_v11, %v1569_v1  ;;  %v2031_v16 = vpop.eup %2030  ;;  %vm1591_vm13 = vweird.f32 %v2029_v11 }
0x10f9   :  { %v1568_v18 = vadd.f32 1.0, %v2031_v16  ;;  %vm1592_vm15 = vmor %vm1590_vm14, %vm1591_vm13  ;;  %vm1773_vm14 = vcmask 254976  }
0x10fa   :  { %v1587_v14 = vsub.f32 1.0, %v1586_v13 }
0x10fb   :  { %2032 = vrcp.f32 %v1568_v18  ;;  %v1581_v36 = vand.u32 2147483648, %v1568_v18  ;;  %vm1575_vm2 = vweird.f32 %v1568_v18  ;;  %v1579_v37 = vand.u32 2147483647, %v1568_v18 }
0x10fc   :  { %v1588_v17 = vmul.f32 %v2029_v11, %v1587_v14  ;;  %2034 = vpow2.f32 %v1835_v60 }
0x10fd   :  { %v1582_v41 = vor.u32 1.1754944e-38, %v1581_v36  ;;  %vm1580_vm4 = vcmp.eq.f32.partialorder %v1579_v37, 8.507059e+37 }
0x10fe   :  { %v1589_v19 = vadd.f32 %v2029_v11, %v1588_v17 }
0x1100   :  { %v1593_v23 = vsel %vm1592_vm15, %v2029_v11, %v1589_v19  ;;  %vm1782_vm15 = vcmask 1024  }
0x1101   :  { %v1598_v57 = vsel %vm1595_vm0, %v1597_v27, %v1593_v23  ;;  %v2033_v28 = vpop.eup %2032 }
0x1102   :  { %v1571_v31 = vmul.f32 %v2033_v28, %v1568_v18  ;;  %v2035_v32 = vpop.eup %2034  ;;  %vm1576_vm1 = vweird.f32 %v2033_v28  ;;  %v1609_v33 = vmul.f32 %v1605_v59, %v1598_v57 }
0x1103   :  { %v1528_v34 = vadd.f32 1.0, %v2035_v32  ;;  %vm1577_vm3 = vmor %vm1575_vm2, %vm1576_vm1 }
0x1104   :  { %v1572_v38 = vsub.f32 1.0, %v1571_v31 }
0x1105   :  { %2036 = vrcp.f32 %v1528_v34  ;;  %v1540_v54 = vand.u32 2147483648, %v1528_v34  ;;  %vm1534_vm6 = vweird.f32 %v1528_v34  ;;  %v1538_v51 = vand.u32 2147483647, %v1528_v34 }
0x1106   :  { %v1573_v35 = vmul.f32 %v2033_v28, %v1572_v38 }
0x1107   :  { %v1541_v44 = vor.u32 1.1754944e-38, %v1540_v54  ;;  %vm1539_vm8 = vcmp.eq.f32.partialorder %v1538_v51, 8.507059e+37 }
0x1108   :  { %v1574_v43 = vadd.f32 %v2033_v28, %v1573_v35 }
0x110a   :  { %v1578_v39 = vsel %vm1577_vm3, %v2033_v28, %v1574_v43 }
0x110b   :  { %v2037_v55 = vpop.eup %2036  ;;  %v1583_v52 = vsel %vm1580_vm4, %v1582_v41, %v1578_v39  ;;  %v1737_v41 = vld [vmem:[#allocation13 + $0x18] sm:$0xff] }
0x110c   :  { %v1530_v24 = vmul.f32 %v2037_v55, %v1528_v34  ;;  %vm1535_vm5 = vweird.f32 %v2037_v55  ;;  %v1608_v63 = vmul.f32 %v1604_v62, %v1583_v52  ;;  %1759 = vmatpush.msrb.mxu0 %v1737_v41 }
0x110d   :  { %vm1536_vm7 = vmor %vm1534_vm6, %vm1535_vm5 }
0x110e   :  { %v1531_v47 = vsub.f32 1.0, %v1530_v24 }
0x1110   :  { %v1532_v49 = vmul.f32 %v2037_v55, %v1531_v47 }
0x1112   :  { %v1533_v25 = vadd.f32 %v2037_v55, %v1532_v49 }
0x1114   :  { %v1537_v58 = vsel %vm1536_vm7, %v2037_v55, %v1533_v25  ;;  %v1857_v25 = vld [vmem:[#allocation14] ss:$0 sm:$0xff] }
0x1115   :  { %v1542_v48 = vsel %vm1539_vm8, %v1541_v44, %v1537_v58  ;;  %v1858_v58 = vld [vmem:[%s2735_s9] ss:$0 sm:$0xff] }
0x1116   :  { %v1545_v0 = vmul.f32 %v1542_v48, %v2683_v45 }
0x1135   :  { %v1615_v50 = vpop.permute.xlu2 %1614 }
0x1136   :  { %v1619_v29 = vmul.f32 %v1615_v50, %v1598_v57 }
0x1138   :  { %1624 = vrot.lane.b32.xlu2 %v1619_v29, %s2271_s10 }
0x114c   :  { %v1613_v42 = vpop.permute.xlu1 %1612 }
0x114d   :  { %v1618_v53 = vmul.f32 %v1613_v42, %v1583_v52  ;;  %v1736_v42 = vld [vmem:[#allocation13 + $0x10] sm:$0xff] }
0x114e   :  { %1760 = vmatpush.msrb.mxu0 %v1736_v42 }
0x114f   :  { %1622 = vrot.lane.b32.xlu1 %v1618_v53, %s2271_s10  ;;  %v1734_v53 = vld [vmem:[#allocation13] sm:$0xff] }
0x1160   :  { %v1548_v46 = vpop.permute.xlu0 %1547 }
0x1161   :  { %v1550_v15 = vmul.f32 %v1548_v46, %v1542_v48 }
0x1163   :  { %1552 = vrot.lane.b32.xlu0 %v1550_v15, %s2271_s10  ;;  %v1859_v15 = vld [vmem:[#allocation2] ss:$0 sm:$0xff] }
0x1192   :  { %v1625_v56 = vpop.permute.xlu2 %1624 }
0x1193   :  { %v1629_v61 = vadd.f32 %v1625_v56, %v1609_v33 }
0x1195   :  { %2038 = vtanh.f32 %v1629_v61 }
0x119b   :  { %v2039_v26 = vpop.eup %2038 }
0x119c   :  { %1636 = vrot.lane.b32.xlu2 %v2039_v26, %s2269_s27 }
0x11c1   :  { %v1623_v9 = vpop.permute.xlu1 %1622 }
0x11c2   :  { %v1628_v2 = vadd.f32 %v1623_v9, %v1608_v63 }
0x11c4   :  { %2040 = vtanh.f32 %v1628_v2 }
0x11ca   :  { %v2041_v4 = vpop.eup %2040 }
0x11cb   :  { %1634 = vrot.lane.b32.xlu1 %v2041_v4, %s2269_s27 }
0x11d5   :  { %v1553_v5 = vpop.permute.xlu0 %1552 }
0x11d6   :  { %v1555_v3 = vadd.f32 %v1553_v5, %v1545_v0 }
0x11d8   :  { %2042 = vtanh.f32 %v1555_v3 }
0x11de   :  { %v2043_v30 = vpop.eup %2042 }
0x11df   :  { %1558 = vrot.lane.b32.xlu0 %v2043_v30, %s2269_s27 }
0x11f6   :  { %v1637_v6 = vpop.permute.xlu2 %1636 }
0x11f7   :  { %v1641_v10 = vmul.f32 %v1637_v6, %v1598_v57 }
0x11f9   :  { %v1670_v40 = vrot.slane %v1641_v10, 6 }
0x123d   :  { %v1635_v8 = vpop.permute.xlu1 %1634 }
0x123e   :  { %v1640_v7 = vmul.f32 %v1635_v8, %v1583_v52  ;;  %v1735_v52 = vld [vmem:[#allocation13 + $0x8] sm:$0xff] }
0x123f   :  { %1761 = vmatpush.msrb.mxu0 %v1735_v52 }
0x1240   :  { %v1669_v1 = vrot.slane %v1640_v7, 7 }
0x1241   :  { %1762 = vmatpush.msrb.mxu0 %v1734_v53 }
0x1242   :  { %v1671_v11 = vsel %vm277_vm9, %v1670_v40, %v1669_v1 }
0x1243   :  { %1672 = vrot.lane.b32.xlu2 %v1671_v11, %s2271_s10 }
0x1251   :  { %v1559_v12 = vpop.permute.xlu0 %1558 }
0x1252   :  { %v1561_v13 = vmul.f32 %v1559_v12, %v1542_v48 }
0x1254   :  { %1643 = vrot.lane.b32.xlu1 %v1561_v13, %s2271_s10 }
0x129d   :  { %v1673_v45 = vpop.permute.xlu2 %1672 }
0x129e   :  { %1839 = vmatmul.msk.f32.vlgmr.msrb.gmra.mxu3 %vm281_vm10, %v1673_v45 }
0x12c6   :  { %v1644_v14 = vpop.permute.xlu1 %1643 }
0x12c7   :  { %1838 = vmatmul.msk.f32.vlgmr.msrb.gmra.mxu2 %vm281_vm10, %v1644_v14 }
0x1321   :  { %v1693_v16 = vpop.f32.mrf.mxu3 }
0x134a   :  { %v1664_v17 = vpop.f32.mrf.mxu2 }
0x134b   :  { %v1694_v18 = vadd.f32 %v1693_v16, %v1664_v17 }
0x134d   :  { %v1696_v19 = vadd.f32 %v2634_v22, %v1694_v18 }
0x134f   :  { %2044 = vtanh.f32 %v1696_v19  ;;  %v1840_v21 = vmul.f32 -1.442695, %v1696_v19 }
0x1351   :  { %2046 = vpow2.f32 %v1840_v21 }
0x1355   :  { %v2045_v20 = vpop.eup %2044 }
0x1356   :  { %1719 = vrot.lane.b32.xlu0 %v2045_v20, %s2269_s27 }
0x1357   :  { %v2047_v23 = vpop.eup %2046 }
0x1358   :  { %v1700_v60 = vadd.f32 1.0, %v2047_v23 }
0x135a   :  { %2048 = vrcp.f32 %v1700_v60  ;;  %v1712_v31 = vand.u32 2147483648, %v1700_v60  ;;  %vm1706_vm11 = vweird.f32 %v1700_v60  ;;  %v1710_v32 = vand.u32 2147483647, %v1700_v60 }
0x135c   :  { %v1713_v38 = vor.u32 1.1754944e-38, %v1712_v31  ;;  %vm1711_vm13 = vcmp.eq.f32.partialorder %v1710_v32, 8.507059e+37 }
0x1360   :  { %v2049_v27 = vpop.eup %2048 }
0x1361   :  { %v1702_v50 = vmul.f32 %v2049_v27, %v1700_v60  ;;  %vm1707_vm9 = vweird.f32 %v2049_v27 }
0x1362   :  { %vm1708_vm12 = vmor %vm1706_vm11, %vm1707_vm9 }
0x1363   :  { %v1703_v57 = vsub.f32 1.0, %v1702_v50 }
0x1365   :  { %v1704_v28 = vmul.f32 %v2049_v27, %v1703_v57 }
0x1367   :  { %v1705_v29 = vadd.f32 %v2049_v27, %v1704_v28 }
0x1369   :  { %v1709_v22 = vsel %vm1708_vm12, %v2049_v27, %v1705_v29 }
0x136a   :  { %v1714_v35 = vsel %vm1711_vm13, %v1713_v38, %v1709_v22 }
0x136b   :  { %v1717_v36 = vmul.f32 %v1714_v35, %v1555_v3 }
0x13c8   :  { %v1720_v34 = vpop.permute.xlu0 %1719 }
0x13c9   :  { %v1722_v43 = vmul.f32 %v1720_v34, %v1714_v35 }
0x13cb   :  { %1724 = vrot.lane.b32.xlu1 %v1722_v43, %s2271_s10 }
0x143d   :  { %v1725_v37 = vpop.permute.xlu1 %1724 }
0x143e   :  { %v1727_v39 = vadd.f32 %v1725_v37, %v1717_v36 }
0x1440   :  { %2050 = vtanh.f32 %v1727_v39 }
0x1446   :  { %v2051_v55 = vpop.eup %2050 }
0x1447   :  { %1730 = vrot.lane.b32.xlu2 %v2051_v55, %s2269_s27 }
0x14a1   :  { %v1731_v24 = vpop.permute.xlu2 %1730 }
0x14a2   :  { %v1733_v47 = vmul.f32 %v1731_v24, %v1714_v35 }
0x14a4   :  { %1743 = vrot.lane.b32.xlu0 %v1733_v47, %s2271_s10 }
0x1516   :  { %v1744_v49 = vpop.permute.xlu0 %1743 }
0x1517   :  { %1841 = vmatmul.msk.f32.vlgmr.msrb.gmra.mxu0 %vm281_vm10, %v1744_v49 }
0x1594   :  { %v1764_v54 = vpop.f32.mrf.mxu0 }
0x1595   :  { %v1765_v51 = vadd.f32 %v1857_v25, %v1764_v54 }
0x1597   :  { %v1767_v44 = vmax.f32 %v1765_v51, 0.0 }
0x1599   :  { %v1772_v46 = vmul.f32 %v1858_v58, %v1767_v44 }
0x159b   :  { %v1774_v48 = vsel %vm1773_vm14, %v1772_v46, 0.0 }
0x159c   :  { %1775 = vadd.xlane.f32.xlu1 %v1774_v48 }
0x160f   :  { %v1776_v59 = vpop.xlane.xlu1 %1775 }
0x1610   :  { %v1781_v33 = vadd.f32 %v1859_v15, %v1776_v59 }
0x1612   :  { %1783 = vst.msk [vmem:[%s2737_s11] sm:$0x3] %vm1782_vm15, %v1781_v33 }
0x1613   :  { %1788 = vsyncpa [#allocation4], 1 }
0x1614   :  { %1789 = vsyncpa [#allocation6], 1 }
0x1615   :  { %1790 = vsyncpa [#allocation9], 1 }
0x1616   :  { %1791 = vsyncpa [#allocation12], 1 }
0x1617   :  { %1792 = vsyncpa [#allocation15], 1 }

</bundles_post_ra>
